<compile_context>
chip_gen: v7x
topology: tpu7x:2x2x1
jax: 0.10.0
libtpu: 0.0.40
codegen_flags: <defaults>
</compile_context>

<pallas_src>
import functools

import numpy as np
import jax
import jax.numpy as jnp
from jax.experimental import pallas as pl
from jax.experimental.pallas import tpu as pltpu

# ----------------------------- padded geometry ------------------------------
_C1P = 8              # conv1 out channels padded (6 -> 8)
_C2 = 16              # conv2 out channels
_C3P = 128            # conv3 out channels padded (120 -> 128)
_F1P = 128            # linear1 out features padded (84 -> 128)
_NOUT = 128           # linear2 out features padded (10 -> 128): lane-dense store

_H0, _W0 = 32, 32     # input spatial
_H1, _W1 = 28, 28     # conv1 output spatial
_HP1 = 14             # pool1 output rows
_H2, _W2 = 10, 10     # conv2 output spatial
_HP2 = 5              # pool2 output rows

_N1 = _W1 * _C1P      # 224 conv1 lanes, packed (x, co)
_N2 = _W2 * _C2       # 160 conv2 lanes, packed (x2, co2)
_K1 = _W0             # 32  conv1 per-tap K (input columns)
_K2 = _N1             # 224 conv2 per-tap K (conv1 lanes)
_K3 = _N2             # 160 conv3 per-tap K (conv2 lanes)


# ------------------------------- fused kernel -------------------------------
def _lenet_kernel(x_ref, w1_ref, b1_ref, w2_ref, b2_ref, w3_ref, b3_ref,
                  wl1_ref, bl1_ref, wl2_ref, bl2_ref, o_ref, *, bt):
    f32, bf16 = jnp.float32, jnp.bfloat16
    # img: (32, bt, 32) -> rows = input y, sublanes = batch, lanes = input x.
    img = x_ref[...]

    # ---- conv1 + ReLU: 5 banded matmuls (K=32, N=224, M=28*bt), one per v-tap.
    h1 = jnp.zeros((_H1 * bt, _N1), f32)
    for i in range(5):
        xi = img[i:i + _H1].reshape(_H1 * bt, _K1).astype(bf16)   # layout-free
        h1 += jnp.dot(xi, w1_ref[i], preferred_element_type=f32)
    h1 = jnp.maximum(h1 + b1_ref[...], 0.0)
    # 2x2 avg-pool, H half: pair-sum rows (0.25 and W pairing are folded into w2).
    h1 = h1.reshape(_HP1, 2, bt, _N1)
    hs1 = h1[:, 0] + h1[:, 1]                                     # (14, bt, 224)

    # ---- conv2 + ReLU (pool1 W-average folded): 5 matmuls (K=224, N=160, M=10*bt).
    h2 = jnp.zeros((_H2 * bt, _N2), f32)
    for i in range(5):
        xi = hs1[i:i + _H2].reshape(_H2 * bt, _K2).astype(bf16)
        h2 += jnp.dot(xi, w2_ref[i], preferred_element_type=f32)
    h2 = jnp.maximum(h2 + b2_ref[...], 0.0)
    h2 = h2.reshape(_HP2, 2, bt, _N2)
    hs2 = h2[:, 0] + h2[:, 1]                                     # (5, bt, 160)

    # ---- conv3 + ReLU (pool2 W-average folded): 5 matmuls (K=160, N=128, M=bt).
    h3 = jnp.zeros((bt, _C3P), f32)
    for i in range(5):
        h3 += jnp.dot(hs2[i].astype(bf16), w3_ref[i], preferred_element_type=f32)
    h3 = jnp.maximum(h3 + b3_ref[...], 0.0)                       # (bt, 128)

    # ---- linear1 + ReLU, linear2.
    h4 = jnp.maximum(
        jnp.dot(h3.astype(bf16), wl1_ref[...], preferred_element_type=f32)
        + bl1_ref[...], 0.0)
    out = jnp.dot(h4.astype(bf16), wl2_ref[...],
                  preferred_element_type=f32) + bl2_ref[...]
    o_ref[...] = out.astype(o_ref.dtype)                          # (bt, 128) dense


# --------------------------- wrapper-side packing ---------------------------
def _pack_params(params):
    """Pre-transpose / zero-pad / band-fold PyTorch-layout params for the kernel."""
    f32, bf16 = jnp.float32, jnp.bfloat16

    def pad_to(a, shape):
        return jnp.pad(a, [(0, s - d) for d, s in zip(a.shape, shape)])

    i_ax = np.arange(5)[:, None, None]                            # vertical tap

    # conv1 banded weight: w1[i, u, x*8+co] = conv1_w[co, 0, i, u - x] (0<=u-x<=4).
    w1p = pad_to(params["conv1_w"][:, 0], (_C1P, 5, 5))            # (8,5,5) [co,i,j]
    u_ax = np.arange(_K1)[None, :, None]
    x_ax = (np.arange(_N1) // _C1P)[None, None, :]
    co_ax = (np.arange(_N1) % _C1P)[None, None, :]
    j1 = u_ax - x_ax
    w1 = jnp.where((j1 >= 0) & (j1 <= 4),
                   w1p[co_ax, i_ax, np.clip(j1, 0, 4)], 0.0).astype(bf16)
    b1 = jnp.tile(pad_to(params["conv1_b"], (_C1P,)), _W1).reshape(1, _N1).astype(f32)

    # conv2 banded weight with pool1's W-average folded in:
    #   w2[i, x*8+c, x2*16+co2] = 0.25 * conv2_w[co2, c, i, x//2 - x2]  (0<=..<=4).
    w2p = pad_to(params["conv2_w"], (_C2, _C1P, 5, 5))             # (16,8,5,5)
    x_in = (np.arange(_K2) // _C1P)[None, :, None]
    c_in = (np.arange(_K2) % _C1P)[None, :, None]
    x2_ax = (np.arange(_N2) // _C2)[None, None, :]
    co2_ax = (np.arange(_N2) % _C2)[None, None, :]
    j2 = x_in // 2 - x2_ax
    w2 = jnp.where((j2 >= 0) & (j2 <= 4),
                   0.25 * w2p[co2_ax, c_in, i_ax, np.clip(j2, 0, 4)],
                   0.0).astype(bf16)
    b2 = jnp.tile(params["conv2_b"], _W2).reshape(1, _N2).astype(f32)

    # conv3 weight with pool2's W-average folded in:
    #   w3[i, x2*16+c2, co3] = 0.25 * conv3_w[co3, c2, i, x2//2].
    w3p = pad_to(params["conv3_w"], (_C3P, _C2, 5, 5))             # (128,16,5,5)
    x2_in = (np.arange(_K3) // _C2)[None, :, None]
    c2_in = (np.arange(_K3) % _C2)[None, :, None]
    co3_ax = np.arange(_C3P)[None, None, :]
    w3 = (0.25 * w3p[co3_ax, c2_in, i_ax, x2_in // 2]).astype(bf16)
    b3 = pad_to(params["conv3_b"], (_C3P,)).reshape(1, _C3P).astype(f32)

    wl1 = pad_to(params["linear1_w"].T, (_C3P, _F1P)).astype(bf16)
    bl1 = pad_to(params["linear1_b"], (_F1P,)).reshape(1, _F1P).astype(f32)
    wl2 = pad_to(params["linear2_w"].T, (_F1P, _NOUT)).astype(bf16)
    bl2 = pad_to(params["linear2_b"], (_NOUT,)).reshape(1, _NOUT).astype(f32)
    return w1, b1, w2, b2, w3, b3, wl1, bl1, wl2, bl2


def lenet_forward(params, x, *, batch_tile=None):
    b = x.shape[0]
    assert x.shape[1:] == (1, 32, 32), x.shape
    bt = b if batch_tile is None else batch_tile     # v7x: pass batch_tile = b // 2
    assert b % bt == 0, (b, bt)
    # bt multiple of 8 keeps batch a full-sublane dim -> every in-kernel reshape
    # is layout-free and the output store is an unmasked (8,128) vreg write.
    assert bt % 8 == 0, bt
    n_tiles = b // bt

    # Raw image, (input-row, batch, input-col) layout; no wrapper-side im2col.
    img = jnp.transpose(x.astype(jnp.float32)[:, 0], (1, 0, 2))   # (32, B, 32)
    packed = _pack_params(params)
    w1, b1, w2, b2, w3, b3, wl1, bl1, wl2, bl2 = packed

    def full(a):
        zeros = (0,) * a.ndim
        return pl.BlockSpec(a.shape, lambda i, z=zeros: z)

    flops = 2 * b * (_H1 * 5 * _K1 * _N1 + _H2 * 5 * _K2 * _N2
                     + 5 * _K3 * _C3P + _C3P * _F1P + _F1P * _NOUT)
    bytes_accessed = int(img.size * 4 + b * _NOUT * 4
                         + sum(int(a.size) * a.dtype.itemsize for a in packed))

    out = pl.pallas_call(
        functools.partial(_lenet_kernel, bt=bt),
        grid=(n_tiles,),
        in_specs=[
            pl.BlockSpec((_H0, bt, _W0), lambda i: (0, i, 0)),    # raw image tile
            full(w1), full(b1), full(w2), full(b2), full(w3), full(b3),
            full(wl1), full(bl1), full(wl2), full(bl2),
        ],
        out_specs=pl.BlockSpec((bt, _NOUT), lambda i: (i, 0)),
        out_shape=jax.ShapeDtypeStruct((b, _NOUT), jnp.float32),
        compiler_params=pltpu.CompilerParams(dimension_semantics=("parallel",)),
        cost_estimate=pl.CostEstimate(flops=flops, transcendentals=0,
                                      bytes_accessed=bytes_accessed),
    )(img, w1, b1, w2, b2, w3, b3, wl1, bl1, wl2, bl2)

    return out[:, :10]


# ------------------------------ params / reference --------------------------
def init_lenet_params(key):
    def uniform(key, shape, fan_in):
        bound = 1.0 / jnp.sqrt(float(fan_in))
        return jax.random.uniform(key, shape, jnp.float32, -bound, bound)

    ks = jax.random.split(key, 10)
    return {
        "conv1_w": uniform(ks[0], (6, 1, 5, 5), 1 * 5 * 5),
        "conv1_b": uniform(ks[1], (6,), 1 * 5 * 5),
        "conv2_w": uniform(ks[2], (16, 6, 5, 5), 6 * 5 * 5),
        "conv2_b": uniform(ks[3], (16,), 6 * 5 * 5),
        "conv3_w": uniform(ks[4], (120, 16, 5, 5), 16 * 5 * 5),
        "conv3_b": uniform(ks[5], (120,), 16 * 5 * 5),
        "linear1_w": uniform(ks[6], (84, 120), 120),
        "linear1_b": uniform(ks[7], (84,), 120),
        "linear2_w": uniform(ks[8], (10, 84), 84),
        "linear2_b": uniform(ks[9], (10,), 84),
    }


def lenet_reference(params, x):
    def conv(x, w, b):
        y = jax.lax.conv_general_dilated(
            x, w, window_strides=(1, 1), padding="VALID",
            dimension_numbers=("NCHW", "OIHW", "NCHW"))
        return y + b.reshape(1, -1, 1, 1)

    def pool(x):
        n, c, h, w = x.shape
        return x.reshape(n, c, h // 2, 2, w // 2, 2).mean(axis=(3, 5))

    x = jax.nn.relu(conv(x, params["conv1_w"], params["conv1_b"]))
    x = pool(x)
    x = jax.nn.relu(conv(x, params["conv2_w"], params["conv2_b"]))
    x = pool(x)
    x = jax.nn.relu(conv(x, params["conv3_w"], params["conv3_b"]))
    x = x.reshape(x.shape[0], -1)
    x = jax.nn.relu(x @ params["linear1_w"].T + params["linear1_b"])
    x = x @ params["linear2_w"].T + params["linear2_b"]
    return x


if __name__ == "__main__":
    key = jax.random.PRNGKey(0)
    k_param, k_data = jax.random.split(key)
    params = init_lenet_params(k_param)
    # LeNet needs 32x32 single-channel input; batch 8 = one full-sublane tile,
    # grid=(1,) on v5e/v6e (use batch_tile=4*... / b//2 on v7x for 2 TCs).
    x = jax.random.normal(k_data, (8, 1, 32, 32), dtype=jnp.float32)

    out = jax.block_until_ready(jax.jit(lenet_forward)(params, x))
    assert out.shape == (8, 10), out.shape
    assert out.dtype == jnp.float32, out.dtype

    ref = jax.jit(lenet_reference)(params, x)
    err = float(jnp.max(jnp.abs(out - ref)))
    assert err < 5e-2, f"max abs error vs reference: {err}"
    print("KERNEL_OK")
</pallas_src>

<mosaic_0001>
module attributes {stable_mosaic.version = 11 : i64} {
  func.func @_lenet_kernel(%arg0: i32, %arg1: memref<32x8x32xf32, #tpu.memory_space<vmem>>, %arg2: memref<5x32x224xbf16, #tpu.memory_space<vmem>>, %arg3: memref<1x224xf32, #tpu.memory_space<vmem>>, %arg4: memref<5x224x160xbf16, #tpu.memory_space<vmem>>, %arg5: memref<1x160xf32, #tpu.memory_space<vmem>>, %arg6: memref<5x160x128xbf16, #tpu.memory_space<vmem>>, %arg7: memref<1x128xf32, #tpu.memory_space<vmem>>, %arg8: memref<128x128xbf16, #tpu.memory_space<vmem>>, %arg9: memref<1x128xf32, #tpu.memory_space<vmem>>, %arg10: memref<128x128xbf16, #tpu.memory_space<vmem>>, %arg11: memref<1x128xf32, #tpu.memory_space<vmem>>, %arg12: memref<8x128xf32, #tpu.memory_space<vmem>>) attributes {dimension_semantics = [#tpu.dimension_semantics<parallel>], iteration_bounds = array<i64: 1>, scalar_prefetch = 0 : i64, scratch_operands = 0 : i64, tpu.core_type = #tpu.core_type<tc>, window_params = [{transform_indices = @transform_0, window_bounds = array<i64: 32, 8, 32>}, {pipeline_mode = #tpu.pipeline_mode<synchronous>, transform_indices = @transform_1, window_bounds = array<i64: 5, 32, 224>}, {pipeline_mode = #tpu.pipeline_mode<synchronous>, transform_indices = @transform_2, window_bounds = array<i64: 1, 224>}, {pipeline_mode = #tpu.pipeline_mode<synchronous>, transform_indices = @transform_3, window_bounds = array<i64: 5, 224, 160>}, {pipeline_mode = #tpu.pipeline_mode<synchronous>, transform_indices = @transform_4, window_bounds = array<i64: 1, 160>}, {pipeline_mode = #tpu.pipeline_mode<synchronous>, transform_indices = @transform_5, window_bounds = array<i64: 5, 160, 128>}, {pipeline_mode = #tpu.pipeline_mode<synchronous>, transform_indices = @transform_6, window_bounds = array<i64: 1, 128>}, {pipeline_mode = #tpu.pipeline_mode<synchronous>, transform_indices = @transform_7, window_bounds = array<i64: 128, 128>}, {pipeline_mode = #tpu.pipeline_mode<synchronous>, transform_indices = @transform_8, window_bounds = array<i64: 1, 128>}, {pipeline_mode = #tpu.pipeline_mode<synchronous>, transform_indices = @transform_9, window_bounds = array<i64: 128, 128>}, {pipeline_mode = #tpu.pipeline_mode<synchronous>, transform_indices = @transform_10, window_bounds = array<i64: 1, 128>}, {transform_indices = @transform_11, window_bounds = array<i64: 8, 128>}]} {
    %c0 = arith.constant 0 : index
    %c0_0 = arith.constant 0 : index
    %c0_1 = arith.constant 0 : index
    %0 = vector.load %arg1[%c0, %c0_0, %c0_1] : memref<32x8x32xf32, #tpu.memory_space<vmem>>, vector<32x8x32xf32>
    %cst = arith.constant 0.000000e+00 : f32
    %1 = vector.broadcast %cst : f32 to vector<224x224xf32>
    %2 = vector.extract_strided_slice %0 {offsets = [0, 0, 0], sizes = [28, 8, 32], strides = [1, 1, 1]} : vector<32x8x32xf32> to vector<28x8x32xf32>
    %3 = vector.shape_cast %2 : vector<28x8x32xf32> to vector<224x32xf32>
    %4 = arith.truncf %3 : vector<224x32xf32> to vector<224x32xbf16>
    %c0_2 = arith.constant 0 : index
    %c0_3 = arith.constant 0 : index
    %c0_4 = arith.constant 0 : index
    %5 = vector.load %arg2[%c0_2, %c0_3, %c0_4] : memref<5x32x224xbf16, #tpu.memory_space<vmem>>, vector<1x32x224xbf16>
    %6 = vector.shape_cast %5 : vector<1x32x224xbf16> to vector<32x224xbf16>
    %cst_5 = arith.constant dense<0.000000e+00> : vector<224x224xf32>
    %7 = tpu.matmul %4, %6, %cst_5 {dimension_numbers = #tpu.dot_dimension_numbers<[1], [0], [0], [1], [0, 0, 1, 1], [], []>} : vector<224x32xbf16>, vector<32x224xbf16>, vector<224x224xf32> -> vector<224x224xf32>
    %8 = arith.addf %1, %7 : vector<224x224xf32>
    %9 = vector.extract_strided_slice %0 {offsets = [1, 0, 0], sizes = [28, 8, 32], strides = [1, 1, 1]} : vector<32x8x32xf32> to vector<28x8x32xf32>
    %10 = vector.shape_cast %9 : vector<28x8x32xf32> to vector<224x32xf32>
    %11 = arith.truncf %10 : vector<224x32xf32> to vector<224x32xbf16>
    %c1 = arith.constant 1 : index
    %c0_6 = arith.constant 0 : index
    %c0_7 = arith.constant 0 : index
    %12 = vector.load %arg2[%c1, %c0_6, %c0_7] : memref<5x32x224xbf16, #tpu.memory_space<vmem>>, vector<1x32x224xbf16>
    %13 = vector.shape_cast %12 : vector<1x32x224xbf16> to vector<32x224xbf16>
    %cst_8 = arith.constant dense<0.000000e+00> : vector<224x224xf32>
    %14 = tpu.matmul %11, %13, %cst_8 {dimension_numbers = #tpu.dot_dimension_numbers<[1], [0], [0], [1], [0, 0, 1, 1], [], []>} : vector<224x32xbf16>, vector<32x224xbf16>, vector<224x224xf32> -> vector<224x224xf32>
    %15 = arith.addf %8, %14 : vector<224x224xf32>
    %16 = vector.extract_strided_slice %0 {offsets = [2, 0, 0], sizes = [28, 8, 32], strides = [1, 1, 1]} : vector<32x8x32xf32> to vector<28x8x32xf32>
    %17 = vector.shape_cast %16 : vector<28x8x32xf32> to vector<224x32xf32>
    %18 = arith.truncf %17 : vector<224x32xf32> to vector<224x32xbf16>
    %c2 = arith.constant 2 : index
    %c0_9 = arith.constant 0 : index
    %c0_10 = arith.constant 0 : index
    %19 = vector.load %arg2[%c2, %c0_9, %c0_10] : memref<5x32x224xbf16, #tpu.memory_space<vmem>>, vector<1x32x224xbf16>
    %20 = vector.shape_cast %19 : vector<1x32x224xbf16> to vector<32x224xbf16>
    %cst_11 = arith.constant dense<0.000000e+00> : vector<224x224xf32>
    %21 = tpu.matmul %18, %20, %cst_11 {dimension_numbers = #tpu.dot_dimension_numbers<[1], [0], [0], [1], [0, 0, 1, 1], [], []>} : vector<224x32xbf16>, vector<32x224xbf16>, vector<224x224xf32> -> vector<224x224xf32>
    %22 = arith.addf %15, %21 : vector<224x224xf32>
    %23 = vector.extract_strided_slice %0 {offsets = [3, 0, 0], sizes = [28, 8, 32], strides = [1, 1, 1]} : vector<32x8x32xf32> to vector<28x8x32xf32>
    %24 = vector.shape_cast %23 : vector<28x8x32xf32> to vector<224x32xf32>
    %25 = arith.truncf %24 : vector<224x32xf32> to vector<224x32xbf16>
    %c3 = arith.constant 3 : index
    %c0_12 = arith.constant 0 : index
    %c0_13 = arith.constant 0 : index
    %26 = vector.load %arg2[%c3, %c0_12, %c0_13] : memref<5x32x224xbf16, #tpu.memory_space<vmem>>, vector<1x32x224xbf16>
    %27 = vector.shape_cast %26 : vector<1x32x224xbf16> to vector<32x224xbf16>
    %cst_14 = arith.constant dense<0.000000e+00> : vector<224x224xf32>
    %28 = tpu.matmul %25, %27, %cst_14 {dimension_numbers = #tpu.dot_dimension_numbers<[1], [0], [0], [1], [0, 0, 1, 1], [], []>} : vector<224x32xbf16>, vector<32x224xbf16>, vector<224x224xf32> -> vector<224x224xf32>
    %29 = arith.addf %22, %28 : vector<224x224xf32>
    %30 = vector.extract_strided_slice %0 {offsets = [4, 0, 0], sizes = [28, 8, 32], strides = [1, 1, 1]} : vector<32x8x32xf32> to vector<28x8x32xf32>
    %31 = vector.shape_cast %30 : vector<28x8x32xf32> to vector<224x32xf32>
    %32 = arith.truncf %31 : vector<224x32xf32> to vector<224x32xbf16>
    %c4 = arith.constant 4 : index
    %c0_15 = arith.constant 0 : index
    %c0_16 = arith.constant 0 : index
    %33 = vector.load %arg2[%c4, %c0_15, %c0_16] : memref<5x32x224xbf16, #tpu.memory_space<vmem>>, vector<1x32x224xbf16>
    %34 = vector.shape_cast %33 : vector<1x32x224xbf16> to vector<32x224xbf16>
    %cst_17 = arith.constant dense<0.000000e+00> : vector<224x224xf32>
    %35 = tpu.matmul %32, %34, %cst_17 {dimension_numbers = #tpu.dot_dimension_numbers<[1], [0], [0], [1], [0, 0, 1, 1], [], []>} : vector<224x32xbf16>, vector<32x224xbf16>, vector<224x224xf32> -> vector<224x224xf32>
    %36 = arith.addf %29, %35 : vector<224x224xf32>
    %c0_18 = arith.constant 0 : index
    %c0_19 = arith.constant 0 : index
    %37 = vector.load %arg3[%c0_18, %c0_19] : memref<1x224xf32, #tpu.memory_space<vmem>>, vector<1x224xf32>
    %38 = vector.broadcast %37 : vector<1x224xf32> to vector<224x224xf32>
    %39 = arith.addf %36, %38 : vector<224x224xf32>
    %cst_20 = arith.constant 0.000000e+00 : f32
    %40 = vector.broadcast %cst_20 : f32 to vector<224x224xf32>
    %41 = arith.maximumf %39, %40 : vector<224x224xf32>
    %42 = vector.shape_cast %41 : vector<224x224xf32> to vector<14x2x8x224xf32>
    %43 = vector.extract_strided_slice %42 {offsets = [0, 0, 0, 0], sizes = [14, 1, 8, 224], strides = [1, 1, 1, 1]} : vector<14x2x8x224xf32> to vector<14x1x8x224xf32>
    %44 = vector.shape_cast %43 : vector<14x1x8x224xf32> to vector<14x8x224xf32>
    %45 = vector.extract_strided_slice %42 {offsets = [0, 1, 0, 0], sizes = [14, 1, 8, 224], strides = [1, 1, 1, 1]} : vector<14x2x8x224xf32> to vector<14x1x8x224xf32>
    %46 = vector.shape_cast %45 : vector<14x1x8x224xf32> to vector<14x8x224xf32>
    %47 = arith.addf %44, %46 : vector<14x8x224xf32>
    %cst_21 = arith.constant 0.000000e+00 : f32
    %48 = vector.broadcast %cst_21 : f32 to vector<80x160xf32>
    %49 = vector.extract_strided_slice %47 {offsets = [0, 0, 0], sizes = [10, 8, 224], strides = [1, 1, 1]} : vector<14x8x224xf32> to vector<10x8x224xf32>
    %50 = vector.shape_cast %49 : vector<10x8x224xf32> to vector<80x224xf32>
    %51 = arith.truncf %50 : vector<80x224xf32> to vector<80x224xbf16>
    %c0_22 = arith.constant 0 : index
    %c0_23 = arith.constant 0 : index
    %c0_24 = arith.constant 0 : index
    %52 = vector.load %arg4[%c0_22, %c0_23, %c0_24] : memref<5x224x160xbf16, #tpu.memory_space<vmem>>, vector<1x224x160xbf16>
    %53 = vector.shape_cast %52 : vector<1x224x160xbf16> to vector<224x160xbf16>
    %cst_25 = arith.constant dense<0.000000e+00> : vector<80x160xf32>
    %54 = tpu.matmul %51, %53, %cst_25 {dimension_numbers = #tpu.dot_dimension_numbers<[1], [0], [0], [1], [0, 0, 1, 1], [], []>} : vector<80x224xbf16>, vector<224x160xbf16>, vector<80x160xf32> -> vector<80x160xf32>
    %55 = arith.addf %48, %54 : vector<80x160xf32>
    %56 = vector.extract_strided_slice %47 {offsets = [1, 0, 0], sizes = [10, 8, 224], strides = [1, 1, 1]} : vector<14x8x224xf32> to vector<10x8x224xf32>
    %57 = vector.shape_cast %56 : vector<10x8x224xf32> to vector<80x224xf32>
    %58 = arith.truncf %57 : vector<80x224xf32> to vector<80x224xbf16>
    %c1_26 = arith.constant 1 : index
    %c0_27 = arith.constant 0 : index
    %c0_28 = arith.constant 0 : index
    %59 = vector.load %arg4[%c1_26, %c0_27, %c0_28] : memref<5x224x160xbf16, #tpu.memory_space<vmem>>, vector<1x224x160xbf16>
    %60 = vector.shape_cast %59 : vector<1x224x160xbf16> to vector<224x160xbf16>
    %cst_29 = arith.constant dense<0.000000e+00> : vector<80x160xf32>
    %61 = tpu.matmul %58, %60, %cst_29 {dimension_numbers = #tpu.dot_dimension_numbers<[1], [0], [0], [1], [0, 0, 1, 1], [], []>} : vector<80x224xbf16>, vector<224x160xbf16>, vector<80x160xf32> -> vector<80x160xf32>
    %62 = arith.addf %55, %61 : vector<80x160xf32>
    %63 = vector.extract_strided_slice %47 {offsets = [2, 0, 0], sizes = [10, 8, 224], strides = [1, 1, 1]} : vector<14x8x224xf32> to vector<10x8x224xf32>
    %64 = vector.shape_cast %63 : vector<10x8x224xf32> to vector<80x224xf32>
    %65 = arith.truncf %64 : vector<80x224xf32> to vector<80x224xbf16>
    %c2_30 = arith.constant 2 : index
    %c0_31 = arith.constant 0 : index
    %c0_32 = arith.constant 0 : index
    %66 = vector.load %arg4[%c2_30, %c0_31, %c0_32] : memref<5x224x160xbf16, #tpu.memory_space<vmem>>, vector<1x224x160xbf16>
    %67 = vector.shape_cast %66 : vector<1x224x160xbf16> to vector<224x160xbf16>
    %cst_33 = arith.constant dense<0.000000e+00> : vector<80x160xf32>
    %68 = tpu.matmul %65, %67, %cst_33 {dimension_numbers = #tpu.dot_dimension_numbers<[1], [0], [0], [1], [0, 0, 1, 1], [], []>} : vector<80x224xbf16>, vector<224x160xbf16>, vector<80x160xf32> -> vector<80x160xf32>
    %69 = arith.addf %62, %68 : vector<80x160xf32>
    %70 = vector.extract_strided_slice %47 {offsets = [3, 0, 0], sizes = [10, 8, 224], strides = [1, 1, 1]} : vector<14x8x224xf32> to vector<10x8x224xf32>
    %71 = vector.shape_cast %70 : vector<10x8x224xf32> to vector<80x224xf32>
    %72 = arith.truncf %71 : vector<80x224xf32> to vector<80x224xbf16>
    %c3_34 = arith.constant 3 : index
    %c0_35 = arith.constant 0 : index
    %c0_36 = arith.constant 0 : index
    %73 = vector.load %arg4[%c3_34, %c0_35, %c0_36] : memref<5x224x160xbf16, #tpu.memory_space<vmem>>, vector<1x224x160xbf16>
    %74 = vector.shape_cast %73 : vector<1x224x160xbf16> to vector<224x160xbf16>
    %cst_37 = arith.constant dense<0.000000e+00> : vector<80x160xf32>
    %75 = tpu.matmul %72, %74, %cst_37 {dimension_numbers = #tpu.dot_dimension_numbers<[1], [0], [0], [1], [0, 0, 1, 1], [], []>} : vector<80x224xbf16>, vector<224x160xbf16>, vector<80x160xf32> -> vector<80x160xf32>
    %76 = arith.addf %69, %75 : vector<80x160xf32>
    %77 = vector.extract_strided_slice %47 {offsets = [4, 0, 0], sizes = [10, 8, 224], strides = [1, 1, 1]} : vector<14x8x224xf32> to vector<10x8x224xf32>
    %78 = vector.shape_cast %77 : vector<10x8x224xf32> to vector<80x224xf32>
    %79 = arith.truncf %78 : vector<80x224xf32> to vector<80x224xbf16>
    %c4_38 = arith.constant 4 : index
    %c0_39 = arith.constant 0 : index
    %c0_40 = arith.constant 0 : index
    %80 = vector.load %arg4[%c4_38, %c0_39, %c0_40] : memref<5x224x160xbf16, #tpu.memory_space<vmem>>, vector<1x224x160xbf16>
    %81 = vector.shape_cast %80 : vector<1x224x160xbf16> to vector<224x160xbf16>
    %cst_41 = arith.constant dense<0.000000e+00> : vector<80x160xf32>
    %82 = tpu.matmul %79, %81, %cst_41 {dimension_numbers = #tpu.dot_dimension_numbers<[1], [0], [0], [1], [0, 0, 1, 1], [], []>} : vector<80x224xbf16>, vector<224x160xbf16>, vector<80x160xf32> -> vector<80x160xf32>
    %83 = arith.addf %76, %82 : vector<80x160xf32>
    %c0_42 = arith.constant 0 : index
    %c0_43 = arith.constant 0 : index
    %84 = vector.load %arg5[%c0_42, %c0_43] : memref<1x160xf32, #tpu.memory_space<vmem>>, vector<1x160xf32>
    %85 = vector.broadcast %84 : vector<1x160xf32> to vector<80x160xf32>
    %86 = arith.addf %83, %85 : vector<80x160xf32>
    %cst_44 = arith.constant 0.000000e+00 : f32
    %87 = vector.broadcast %cst_44 : f32 to vector<80x160xf32>
    %88 = arith.maximumf %86, %87 : vector<80x160xf32>
    %89 = vector.shape_cast %88 : vector<80x160xf32> to vector<5x2x8x160xf32>
    %90 = vector.extract_strided_slice %89 {offsets = [0, 0, 0, 0], sizes = [5, 1, 8, 160], strides = [1, 1, 1, 1]} : vector<5x2x8x160xf32> to vector<5x1x8x160xf32>
    %91 = vector.shape_cast %90 : vector<5x1x8x160xf32> to vector<5x8x160xf32>
    %92 = vector.extract_strided_slice %89 {offsets = [0, 1, 0, 0], sizes = [5, 1, 8, 160], strides = [1, 1, 1, 1]} : vector<5x2x8x160xf32> to vector<5x1x8x160xf32>
    %93 = vector.shape_cast %92 : vector<5x1x8x160xf32> to vector<5x8x160xf32>
    %94 = arith.addf %91, %93 : vector<5x8x160xf32>
    %cst_45 = arith.constant 0.000000e+00 : f32
    %95 = vector.broadcast %cst_45 : f32 to vector<8x128xf32>
    %96 = vector.extract_strided_slice %94 {offsets = [0, 0, 0], sizes = [1, 8, 160], strides = [1, 1, 1]} : vector<5x8x160xf32> to vector<1x8x160xf32>
    %97 = vector.shape_cast %96 : vector<1x8x160xf32> to vector<8x160xf32>
    %98 = arith.truncf %97 : vector<8x160xf32> to vector<8x160xbf16>
    %c0_46 = arith.constant 0 : index
    %c0_47 = arith.constant 0 : index
    %c0_48 = arith.constant 0 : index
    %99 = vector.load %arg6[%c0_46, %c0_47, %c0_48] : memref<5x160x128xbf16, #tpu.memory_space<vmem>>, vector<1x160x128xbf16>
    %100 = vector.shape_cast %99 : vector<1x160x128xbf16> to vector<160x128xbf16>
    %cst_49 = arith.constant dense<0.000000e+00> : vector<8x128xf32>
    %101 = tpu.matmul %98, %100, %cst_49 {dimension_numbers = #tpu.dot_dimension_numbers<[1], [0], [0], [1], [0, 0, 1, 1], [], []>} : vector<8x160xbf16>, vector<160x128xbf16>, vector<8x128xf32> -> vector<8x128xf32>
    %102 = arith.addf %95, %101 : vector<8x128xf32>
    %103 = vector.extract_strided_slice %94 {offsets = [1, 0, 0], sizes = [1, 8, 160], strides = [1, 1, 1]} : vector<5x8x160xf32> to vector<1x8x160xf32>
    %104 = vector.shape_cast %103 : vector<1x8x160xf32> to vector<8x160xf32>
    %105 = arith.truncf %104 : vector<8x160xf32> to vector<8x160xbf16>
    %c1_50 = arith.constant 1 : index
    %c0_51 = arith.constant 0 : index
    %c0_52 = arith.constant 0 : index
    %106 = vector.load %arg6[%c1_50, %c0_51, %c0_52] : memref<5x160x128xbf16, #tpu.memory_space<vmem>>, vector<1x160x128xbf16>
    %107 = vector.shape_cast %106 : vector<1x160x128xbf16> to vector<160x128xbf16>
    %cst_53 = arith.constant dense<0.000000e+00> : vector<8x128xf32>
    %108 = tpu.matmul %105, %107, %cst_53 {dimension_numbers = #tpu.dot_dimension_numbers<[1], [0], [0], [1], [0, 0, 1, 1], [], []>} : vector<8x160xbf16>, vector<160x128xbf16>, vector<8x128xf32> -> vector<8x128xf32>
    %109 = arith.addf %102, %108 : vector<8x128xf32>
    %110 = vector.extract_strided_slice %94 {offsets = [2, 0, 0], sizes = [1, 8, 160], strides = [1, 1, 1]} : vector<5x8x160xf32> to vector<1x8x160xf32>
    %111 = vector.shape_cast %110 : vector<1x8x160xf32> to vector<8x160xf32>
    %112 = arith.truncf %111 : vector<8x160xf32> to vector<8x160xbf16>
    %c2_54 = arith.constant 2 : index
    %c0_55 = arith.constant 0 : index
    %c0_56 = arith.constant 0 : index
    %113 = vector.load %arg6[%c2_54, %c0_55, %c0_56] : memref<5x160x128xbf16, #tpu.memory_space<vmem>>, vector<1x160x128xbf16>
    %114 = vector.shape_cast %113 : vector<1x160x128xbf16> to vector<160x128xbf16>
    %cst_57 = arith.constant dense<0.000000e+00> : vector<8x128xf32>
    %115 = tpu.matmul %112, %114, %cst_57 {dimension_numbers = #tpu.dot_dimension_numbers<[1], [0], [0], [1], [0, 0, 1, 1], [], []>} : vector<8x160xbf16>, vector<160x128xbf16>, vector<8x128xf32> -> vector<8x128xf32>
    %116 = arith.addf %109, %115 : vector<8x128xf32>
    %117 = vector.extract_strided_slice %94 {offsets = [3, 0, 0], sizes = [1, 8, 160], strides = [1, 1, 1]} : vector<5x8x160xf32> to vector<1x8x160xf32>
    %118 = vector.shape_cast %117 : vector<1x8x160xf32> to vector<8x160xf32>
    %119 = arith.truncf %118 : vector<8x160xf32> to vector<8x160xbf16>
    %c3_58 = arith.constant 3 : index
    %c0_59 = arith.constant 0 : index
    %c0_60 = arith.constant 0 : index
    %120 = vector.load %arg6[%c3_58, %c0_59, %c0_60] : memref<5x160x128xbf16, #tpu.memory_space<vmem>>, vector<1x160x128xbf16>
    %121 = vector.shape_cast %120 : vector<1x160x128xbf16> to vector<160x128xbf16>
    %cst_61 = arith.constant dense<0.000000e+00> : vector<8x128xf32>
    %122 = tpu.matmul %119, %121, %cst_61 {dimension_numbers = #tpu.dot_dimension_numbers<[1], [0], [0], [1], [0, 0, 1, 1], [], []>} : vector<8x160xbf16>, vector<160x128xbf16>, vector<8x128xf32> -> vector<8x128xf32>
    %123 = arith.addf %116, %122 : vector<8x128xf32>
    %124 = vector.extract_strided_slice %94 {offsets = [4, 0, 0], sizes = [1, 8, 160], strides = [1, 1, 1]} : vector<5x8x160xf32> to vector<1x8x160xf32>
    %125 = vector.shape_cast %124 : vector<1x8x160xf32> to vector<8x160xf32>
    %126 = arith.truncf %125 : vector<8x160xf32> to vector<8x160xbf16>
    %c4_62 = arith.constant 4 : index
    %c0_63 = arith.constant 0 : index
    %c0_64 = arith.constant 0 : index
    %127 = vector.load %arg6[%c4_62, %c0_63, %c0_64] : memref<5x160x128xbf16, #tpu.memory_space<vmem>>, vector<1x160x128xbf16>
    %128 = vector.shape_cast %127 : vector<1x160x128xbf16> to vector<160x128xbf16>
    %cst_65 = arith.constant dense<0.000000e+00> : vector<8x128xf32>
    %129 = tpu.matmul %126, %128, %cst_65 {dimension_numbers = #tpu.dot_dimension_numbers<[1], [0], [0], [1], [0, 0, 1, 1], [], []>} : vector<8x160xbf16>, vector<160x128xbf16>, vector<8x128xf32> -> vector<8x128xf32>
    %130 = arith.addf %123, %129 : vector<8x128xf32>
    %c0_66 = arith.constant 0 : index
    %c0_67 = arith.constant 0 : index
    %131 = vector.load %arg7[%c0_66, %c0_67] : memref<1x128xf32, #tpu.memory_space<vmem>>, vector<1x128xf32>
    %132 = vector.broadcast %131 : vector<1x128xf32> to vector<8x128xf32>
    %133 = arith.addf %130, %132 : vector<8x128xf32>
    %cst_68 = arith.constant 0.000000e+00 : f32
    %134 = vector.broadcast %cst_68 : f32 to vector<8x128xf32>
    %135 = arith.maximumf %133, %134 : vector<8x128xf32>
    %136 = arith.truncf %135 : vector<8x128xf32> to vector<8x128xbf16>
    %c0_69 = arith.constant 0 : index
    %c0_70 = arith.constant 0 : index
    %137 = vector.load %arg8[%c0_69, %c0_70] : memref<128x128xbf16, #tpu.memory_space<vmem>>, vector<128x128xbf16>
    %cst_71 = arith.constant dense<0.000000e+00> : vector<8x128xf32>
    %138 = tpu.matmul %136, %137, %cst_71 {dimension_numbers = #tpu.dot_dimension_numbers<[1], [0], [0], [1], [0, 0, 1, 1], [], []>} : vector<8x128xbf16>, vector<128x128xbf16>, vector<8x128xf32> -> vector<8x128xf32>
    %c0_72 = arith.constant 0 : index
    %c0_73 = arith.constant 0 : index
    %139 = vector.load %arg9[%c0_72, %c0_73] : memref<1x128xf32, #tpu.memory_space<vmem>>, vector<1x128xf32>
    %140 = vector.broadcast %139 : vector<1x128xf32> to vector<8x128xf32>
    %141 = arith.addf %138, %140 : vector<8x128xf32>
    %cst_74 = arith.constant 0.000000e+00 : f32
    %142 = vector.broadcast %cst_74 : f32 to vector<8x128xf32>
    %143 = arith.maximumf %141, %142 : vector<8x128xf32>
    %144 = arith.truncf %143 : vector<8x128xf32> to vector<8x128xbf16>
    %c0_75 = arith.constant 0 : index
    %c0_76 = arith.constant 0 : index
    %145 = vector.load %arg10[%c0_75, %c0_76] : memref<128x128xbf16, #tpu.memory_space<vmem>>, vector<128x128xbf16>
    %cst_77 = arith.constant dense<0.000000e+00> : vector<8x128xf32>
    %146 = tpu.matmul %144, %145, %cst_77 {dimension_numbers = #tpu.dot_dimension_numbers<[1], [0], [0], [1], [0, 0, 1, 1], [], []>} : vector<8x128xbf16>, vector<128x128xbf16>, vector<8x128xf32> -> vector<8x128xf32>
    %c0_78 = arith.constant 0 : index
    %c0_79 = arith.constant 0 : index
    %147 = vector.load %arg11[%c0_78, %c0_79] : memref<1x128xf32, #tpu.memory_space<vmem>>, vector<1x128xf32>
    %148 = vector.broadcast %147 : vector<1x128xf32> to vector<8x128xf32>
    %149 = arith.addf %146, %148 : vector<8x128xf32>
    %c0_80 = arith.constant 0 : index
    %c0_81 = arith.constant 0 : index
    %150 = vector.load %arg12[%c0_80, %c0_81] : memref<8x128xf32, #tpu.memory_space<vmem>>, vector<8x128xf32>
    tpu.vector_store %arg12[%c0_80, %c0_81], %149 {strides = array<i32>} : memref<8x128xf32, #tpu.memory_space<vmem>>, vector<8x128xf32>,
    return
  }
  func.func @transform_0(%arg0: i32) -> (i32, i32, i32) {
    %c0_i32 = arith.constant 0 : i32
    %c0_i32_0 = arith.constant 0 : i32
    %c0_i32_1 = arith.constant 0 : i32
    return %c0_i32, %arg0, %c0_i32_0 : i32, i32, i32
  }
  func.func @transform_1(%arg0: i32) -> (i32, i32, i32) {
    %c0_i32 = arith.constant 0 : i32
    %c0_i32_0 = arith.constant 0 : i32
    %c0_i32_1 = arith.constant 0 : i32
    %c0_i32_2 = arith.constant 0 : i32
    return %c0_i32, %c0_i32_0, %c0_i32_1 : i32, i32, i32
  }
  func.func @transform_2(%arg0: i32) -> (i32, i32) {
    %c0_i32 = arith.constant 0 : i32
    %c0_i32_0 = arith.constant 0 : i32
    %c0_i32_1 = arith.constant 0 : i32
    return %c0_i32, %c0_i32_0 : i32, i32
  }
  func.func @transform_3(%arg0: i32) -> (i32, i32, i32) {
    %c0_i32 = arith.constant 0 : i32
    %c0_i32_0 = arith.constant 0 : i32
    %c0_i32_1 = arith.constant 0 : i32
    %c0_i32_2 = arith.constant 0 : i32
    return %c0_i32, %c0_i32_0, %c0_i32_1 : i32, i32, i32
  }
  func.func @transform_4(%arg0: i32) -> (i32, i32) {
    %c0_i32 = arith.constant 0 : i32
    %c0_i32_0 = arith.constant 0 : i32
    %c0_i32_1 = arith.constant 0 : i32
    return %c0_i32, %c0_i32_0 : i32, i32
  }
  func.func @transform_5(%arg0: i32) -> (i32, i32, i32) {
    %c0_i32 = arith.constant 0 : i32
    %c0_i32_0 = arith.constant 0 : i32
    %c0_i32_1 = arith.constant 0 : i32
    %c0_i32_2 = arith.constant 0 : i32
    return %c0_i32, %c0_i32_0, %c0_i32_1 : i32, i32, i32
  }
  func.func @transform_6(%arg0: i32) -> (i32, i32) {
    %c0_i32 = arith.constant 0 : i32
    %c0_i32_0 = arith.constant 0 : i32
    %c0_i32_1 = arith.constant 0 : i32
    return %c0_i32, %c0_i32_0 : i32, i32
  }
  func.func @transform_7(%arg0: i32) -> (i32, i32) {
    %c0_i32 = arith.constant 0 : i32
    %c0_i32_0 = arith.constant 0 : i32
    %c0_i32_1 = arith.constant 0 : i32
    return %c0_i32, %c0_i32_0 : i32, i32
  }
  func.func @transform_8(%arg0: i32) -> (i32, i32) {
    %c0_i32 = arith.constant 0 : i32
    %c0_i32_0 = arith.constant 0 : i32
    %c0_i32_1 = arith.constant 0 : i32
    return %c0_i32, %c0_i32_0 : i32, i32
  }
  func.func @transform_9(%arg0: i32) -> (i32, i32) {
    %c0_i32 = arith.constant 0 : i32
    %c0_i32_0 = arith.constant 0 : i32
    %c0_i32_1 = arith.constant 0 : i32
    return %c0_i32, %c0_i32_0 : i32, i32
  }
  func.func @transform_10(%arg0: i32) -> (i32, i32) {
    %c0_i32 = arith.constant 0 : i32
    %c0_i32_0 = arith.constant 0 : i32
    %c0_i32_1 = arith.constant 0 : i32
    return %c0_i32, %c0_i32_0 : i32, i32
  }
  func.func @transform_11(%arg0: i32) -> (i32, i32) {
    %c0_i32 = arith.constant 0 : i32
    %c0_i32_0 = arith.constant 0 : i32
    return %arg0, %c0_i32 : i32, i32
  }
}

</mosaic_0001>

<bundles_post_ra>
// kernel: tile.13
= control target key start
LH: loop header
LB: loop body
LE: loop exit
PB: predicated region body
PF: predicated region fallthrough
CT: control target
= control target key end

     0   :  { %s40_s0 = inlined_call_operand.vmem [shape: f32[8], index: 0, kind: input, shape index: {}]   ;;  %s41_s1 = inlined_call_operand.vmem [shape: f32[28,8], index: 1, kind: output, shape index: {}]  }
   0x1   :  { %v4_v0 = vld [vmem:[%s40_s0] ss:$0 sm:$0xff] }
   0x2   :  { %5 = vst [vmem:[%s41_s1] sm:$0xff] %v4_v0  ;;  %12 = vst [vmem:[%s41_s1 + $0x8] sm:$0xff] %v4_v0 }
   0x3   :  { %13 = vst [vmem:[%s41_s1 + $0x10] sm:$0xff] %v4_v0  ;;  %14 = vst [vmem:[%s41_s1 + $0x18] sm:$0xff] %v4_v0 }

// kernel: tile.14
= control target key start
LH: loop header
LB: loop body
LE: loop exit
PB: predicated region body
PF: predicated region fallthrough
CT: control target
= control target key end

     0   :  { %s149_s10 = smov 120   ;;  %s150_s11 = smov 104   ;;  %vm4_vm0 = vcmask 64512   ;;  %vm10_vm1 = vcmask 1048512   ;;  %vm16_vm2 = vcmask 982912   ;;  %vm22_vm3 = vcmask 917312   ;;  %s228_s0 = inlined_call_operand.vmem [shape: f32[28,8], index: 0, kind: input, shape index: {}]   ;;  %s229_s1 = inlined_call_operand.vmem [shape: f32[1,224], index: 1, kind: output, shape index: {}]  }
   0x1   :  { %v118_v0 = vld [vmem:[%s228_s0 + $0xf] sm:$0x1]   ;;  %v120_v1 = vld [vmem:[%s228_s0 + $0xd] sm:$0x1]   ;;  %v119_v2 = vld [vmem:[%s228_s0 + $0xe] sm:$0x1]  }
   0x2   :  { %8 = vrot.lane.b32.xlu0 %v118_v0, %s149_s10  ;;  %20 = vrot.lane.b32.xlu1 %v120_v1, %s150_s11  ;;  %v121_v3 = vld [vmem:[%s228_s0 + $0xc] sm:$0x1]   ;;  %s31_s16 = smov 3  ;;  %s38_s17 = smov 3  ;;  %vm28_vm4 = vcmask 851712   ;;  %vm35_vm5 = vcmask 786112  }
   0x3   :  { %s151_s18 = smov 112   ;;  %s152_s19 = smov 96   ;;  %v122_v4 = vld [vmem:[%s228_s0 + $0xb] ss:$16 sm:%s31_s16]   ;;  %v123_v5 = vld [vmem:[%s228_s0 + $0xa] ss:$16 sm:%s38_s17]  }
   0x4   :  { %s45_s24 = smov 3  ;;  %s52_s25 = smov 3  ;;  %vm42_vm6 = vcmask 720512   ;;  %vm49_vm7 = vcmask 654912   ;;  %vm56_vm8 = vcmask 589312   ;;  %vm63_vm9 = vcmask 523712  }
   0x5   :  { %s153_s26 = smov 88   ;;  %s154_s27 = smov 80   ;;  %v124_v6 = vld [vmem:[%s228_s0 + $0x9] ss:$16 sm:%s45_s24]   ;;  %v125_v7 = vld [vmem:[%s228_s0 + $0x8] ss:$16 sm:%s52_s25]  }
   0x6   :  { %14 = vrot.lane.b32.xlu0 %v119_v2, %s151_s18  ;;  %26 = vrot.lane.b32.xlu1 %v121_v3, %s152_s19  ;;  %s59_s3 = smov 3  ;;  %s66_s4 = smov 3  ;;  %vm70_vm10 = vcmask 458112   ;;  %vm77_vm11 = vcmask 392512   ;;  %vm84_vm12 = vcmask 326912   ;;  %vm91_vm13 = vcmask 261312  }
   0x7   :  { %s155_s5 = smov 72   ;;  %s156_s6 = smov 64   ;;  %v126_v8 = vld [vmem:[%s228_s0 + $0x7] ss:$16 sm:%s59_s3]   ;;  %v127_v9 = vld [vmem:[%s228_s0 + $0x6] ss:$16 sm:%s66_s4]  }
   0x8   :  { %s2_s9 = smov 3  ;;  %s73_s14 = smov 3  ;;  %vm98_vm14 = vcmask 195712   ;;  %vm105_vm15 = vcmask 130112  }
   0x9   :  { %v3_v10 = vld [vmem:[%s228_s0] ss:$16 sm:%s2_s9]   ;;  %s80_s15 = smov 3  ;;  %s157_s16 = smov 56   ;;  %v128_v11 = vld [vmem:[%s228_s0 + $0x5] ss:$16 sm:%s73_s14]  }
   0xa   :  { %33 = vrot.lane.b32.xlu0 %v122_v4, %s153_s26  ;;  %40 = vrot.lane.b32.xlu1 %v123_v5, %s154_s27  ;;  %5 = vst.msk [vmem:[#allocation0] ss:$8 sm:$0x3] %vm4_vm0, %v3_v10   ;;  %s158_s17 = smov 48   ;;  %v129_v12 = vld [vmem:[%s228_s0 + $0x4] ss:$16 sm:%s80_s15]  }
   0xb   :  { %s87_s22 = smov 3  ;;  %s94_s23 = smov 3 }
   0xc   :  { %s159_s24 = smov 40   ;;  %s160_s25 = smov 32   ;;  %v130_v13 = vld [vmem:[%s228_s0 + $0x3] ss:$16 sm:%s87_s22]   ;;  %v131_v14 = vld [vmem:[%s228_s0 + $0x2] ss:$16 sm:%s94_s23]  }
   0xd   :  { %s101_s30 = smov 3  ;;  %s161_s2 = smov 24  }
   0xe   :  { %47 = vrot.lane.b32.xlu0 %v124_v6, %s155_s5  ;;  %54 = vrot.lane.b32.xlu1 %v125_v7, %s156_s6  ;;  %s162_s3 = smov 16   ;;  %v132_v15 = vld [vmem:[%s228_s0 + $0x1] ss:$16 sm:%s101_s30]   ;;  %s163_s0 = smov 8  }
  0x12   :  { %61 = vrot.lane.b32.xlu0 %v126_v8, %s157_s16  ;;  %68 = vrot.lane.b32.xlu1 %v127_v9, %s158_s17 }
  0x16   :  { %75 = vrot.lane.b32.xlu0 %v128_v11, %s159_s24  ;;  %82 = vrot.lane.b32.xlu1 %v129_v12, %s160_s25 }
  0x1a   :  { %89 = vrot.lane.b32.xlu0 %v130_v13, %s161_s2  ;;  %96 = vrot.lane.b32.xlu1 %v131_v14, %s162_s3 }
  0x1e   :  { %103 = vrot.lane.b32.xlu0 %v132_v15, %s163_s0 }
  0x74   :  { %v9_v16 = vpop.permute.xlu0 %8   ;;  %v21_v17 = vpop.permute.xlu1 %20  }
  0x75   :  { %11 = vst.msk [vmem:[#allocation0] sm:$0x1] %vm10_vm1, %v9_v16  }
  0x78   :  { %v15_v18 = vpop.permute.xlu0 %14   ;;  %v27_v19 = vpop.permute.xlu1 %26  }
  0x79   :  { %17 = vst.msk [vmem:[#allocation0] sm:$0x1] %vm16_vm2, %v15_v18  }
  0x7a   :  { %23 = vst.msk [vmem:[#allocation0] sm:$0x1] %vm22_vm3, %v21_v17  }
  0x7b   :  { %29 = vst.msk [vmem:[#allocation0] sm:$0x1] %vm28_vm4, %v27_v19  }
  0x7c   :  { %v34_v20 = vpop.permute.xlu0 %33   ;;  %v41_v21 = vpop.permute.xlu1 %40  }
  0x7d   :  { %36 = vst.msk [vmem:[#allocation0] ss:$8 sm:$0x3] %vm35_vm5, %v34_v20  }
  0x7e   :  { %43 = vst.msk [vmem:[#allocation0] ss:$8 sm:$0x3] %vm42_vm6, %v41_v21  }
  0x80   :  { %v48_v22 = vpop.permute.xlu0 %47   ;;  %v55_v23 = vpop.permute.xlu1 %54  }
  0x81   :  { %50 = vst.msk [vmem:[#allocation0] ss:$8 sm:$0x3] %vm49_vm7, %v48_v22  }
  0x82   :  { %57 = vst.msk [vmem:[#allocation0] ss:$8 sm:$0x3] %vm56_vm8, %v55_v23  }
  0x84   :  { %v62_v24 = vpop.permute.xlu0 %61   ;;  %v69_v25 = vpop.permute.xlu1 %68  }
  0x85   :  { %64 = vst.msk [vmem:[#allocation0] ss:$8 sm:$0x3] %vm63_vm9, %v62_v24  }
  0x86   :  { %71 = vst.msk [vmem:[#allocation0] ss:$8 sm:$0x3] %vm70_vm10, %v69_v25  }
  0x88   :  { %v76_v26 = vpop.permute.xlu0 %75   ;;  %v83_v27 = vpop.permute.xlu1 %82  }
  0x89   :  { %78 = vst.msk [vmem:[#allocation0] ss:$8 sm:$0x3] %vm77_vm11, %v76_v26  }
  0x8a   :  { %85 = vst.msk [vmem:[#allocation0] ss:$8 sm:$0x3] %vm84_vm12, %v83_v27  }
  0x8c   :  { %v90_v28 = vpop.permute.xlu0 %89   ;;  %v97_v29 = vpop.permute.xlu1 %96  }
  0x8d   :  { %92 = vst.msk [vmem:[#allocation0] ss:$8 sm:$0x3] %vm91_vm13, %v90_v28  }
  0x8e   :  { %99 = vst.msk [vmem:[#allocation0] ss:$8 sm:$0x3] %vm98_vm14, %v97_v29  }
  0x90   :  { %v104_v30 = vpop.permute.xlu0 %103  }
  0x91   :  { %106 = vst.msk [vmem:[#allocation0] ss:$8 sm:$0x3] %vm105_vm15, %v104_v30  }
  0x98   :  { %v110_v31 = vld [vmem:[#allocation0] sm:$0x1]  ;;  %v114_v32 = vld [vmem:[#allocation0 + $0x8] sm:$0x1] }
  0x99   :  { %112 = vst [vmem:[%s229_s1] sm:$0x1] %v110_v31  ;;  %133 = vst [vmem:[%s229_s1 + $0x1] sm:$0x1] %v114_v32 }

// kernel: tile.18
= control target key start
LH: loop header
LB: loop body
LE: loop exit
PB: predicated region body
PF: predicated region fallthrough
CT: control target
= control target key end

     0   :  { %s28_s0 = inlined_call_operand.vmem [shape: f32[16], index: 0, kind: input, shape index: {}]   ;;  %s29_s1 = inlined_call_operand.vmem [shape: f32[10,16], index: 1, kind: output, shape index: {}]  }
   0x1   :  { %v4_v0 = vld [vmem:[%s28_s0] ss:$0 sm:$0xff] }
   0x2   :  { %5 = vst [vmem:[%s29_s1] sm:$0xff] %v4_v0  ;;  %8 = vst [vmem:[%s29_s1 + $0x8] sm:$0xff] %v4_v0 }

// kernel: tile.19
= control target key start
LH: loop header
LB: loop body
LE: loop exit
PB: predicated region body
PF: predicated region fallthrough
CT: control target
= control target key end

     0   :  { %s75_s10 = smov 112   ;;  %s76_s11 = smov 80   ;;  %vm4_vm0 = vcmask 130048   ;;  %vm10_vm1 = vcmask 1048448   ;;  %vm16_vm2 = vcmask 917248   ;;  %vm22_vm3 = vcmask 786048   ;;  %s122_s0 = inlined_call_operand.vmem [shape: f32[10,16], index: 0, kind: input, shape index: {}]   ;;  %s123_s1 = inlined_call_operand.vmem [shape: f32[1,160], index: 1, kind: output, shape index: {}]  }
   0x1   :  { %v60_v0 = vld [vmem:[%s122_s0 + $0x7] sm:$0x1]   ;;  %v62_v1 = vld [vmem:[%s122_s0 + $0x5] sm:$0x1]   ;;  %v61_v2 = vld [vmem:[%s122_s0 + $0x6] sm:$0x1]  }
   0x2   :  { %8 = vrot.lane.b32.xlu0 %v60_v0, %s75_s10  ;;  %20 = vrot.lane.b32.xlu1 %v62_v1, %s76_s11  ;;  %v63_v3 = vld [vmem:[%s122_s0 + $0x4] sm:$0x1]   ;;  %s2_s16 = smov 3  ;;  %s77_s17 = smov 96   ;;  %v64_v5 = vld [vmem:[%s122_s0 + $0x3] sm:$0x1]  }
   0x3   :  { %s78_s18 = smov 64   ;;  %v3_v4 = vld [vmem:[%s122_s0] ss:$8 sm:%s2_s16]   ;;  %v65_v6 = vld [vmem:[%s122_s0 + $0x2] sm:$0x1]   ;;  %s43_s25 = smov 3 }
   0x4   :  { %5 = vst.msk [vmem:[#allocation0] ss:$8 sm:$0x3] %vm4_vm0, %v3_v4   ;;  %s79_s26 = smov 48   ;;  %s80_s27 = smov 32   ;;  %vm28_vm4 = vcmask 654848  }
   0x5   :  { %v66_v7 = vld [vmem:[%s122_s0 + $0x1] ss:$8 sm:%s43_s25]   ;;  %s81_s0 = smov 16   ;;  %vm34_vm5 = vcmask 523648   ;;  %vm40_vm6 = vcmask 392448   ;;  %vm47_vm7 = vcmask 261248  }
   0x6   :  { %14 = vrot.lane.b32.xlu0 %v61_v2, %s77_s17  ;;  %26 = vrot.lane.b32.xlu1 %v63_v3, %s78_s18 }
   0xa   :  { %32 = vrot.lane.b32.xlu0 %v64_v5, %s79_s26  ;;  %38 = vrot.lane.b32.xlu1 %v65_v6, %s80_s27 }
   0xe   :  { %45 = vrot.lane.b32.xlu0 %v66_v7, %s81_s0 }
  0x74   :  { %v9_v8 = vpop.permute.xlu0 %8   ;;  %v21_v9 = vpop.permute.xlu1 %20  }
  0x75   :  { %11 = vst.msk [vmem:[#allocation0] sm:$0x1] %vm10_vm1, %v9_v8  }
  0x78   :  { %v15_v10 = vpop.permute.xlu0 %14   ;;  %v27_v11 = vpop.permute.xlu1 %26  }
  0x79   :  { %17 = vst.msk [vmem:[#allocation0] sm:$0x1] %vm16_vm2, %v15_v10  }
  0x7a   :  { %23 = vst.msk [vmem:[#allocation0] sm:$0x1] %vm22_vm3, %v21_v9  }
  0x7b   :  { %29 = vst.msk [vmem:[#allocation0] sm:$0x1] %vm28_vm4, %v27_v11  }
  0x7c   :  { %v33_v12 = vpop.permute.xlu0 %32   ;;  %v39_v13 = vpop.permute.xlu1 %38  }
  0x7d   :  { %35 = vst.msk [vmem:[#allocation0] sm:$0x1] %vm34_vm5, %v33_v12  }
  0x7e   :  { %41 = vst.msk [vmem:[#allocation0] sm:$0x1] %vm40_vm6, %v39_v13  }
  0x80   :  { %v46_v14 = vpop.permute.xlu0 %45  }
  0x81   :  { %48 = vst.msk [vmem:[#allocation0] ss:$8 sm:$0x3] %vm47_vm7, %v46_v14  }
  0x88   :  { %v52_v15 = vld [vmem:[#allocation0] sm:$0x1]  ;;  %v56_v16 = vld [vmem:[#allocation0 + $0x8] sm:$0x1] }
  0x89   :  { %54 = vst [vmem:[%s123_s1] sm:$0x1] %v52_v15  ;;  %67 = vst [vmem:[%s123_s1 + $0x1] sm:$0x1] %v56_v16 }

// kernel: lenet_forward.1
= control target key start
LH: loop header
LB: loop body
LE: loop exit
PB: predicated region body
PF: predicated region fallthrough
CT: control target
= control target key end

     0   :  { %v5067_v2 = vmov 0   ;;  %vm129_vm0 = vcmask 261120   ;;  %s6556_s0 = inlined_call_operand.vmem [shape: f32[32,8,32], index: 0, kind: input, shape index: {}]   ;;  %s6557_s1 = inlined_call_operand.vmem [shape: bf16[5,32,224], index: 1, kind: input, shape index: {}]   ;;  %s6558_s2 = inlined_call_operand.vmem [shape: f32[1,224], index: 2, kind: input, shape index: {}]   ;;  %s6559_s3 = inlined_call_operand.vmem [shape: bf16[5,224,160], index: 3, kind: input, shape index: {}]   ;;  %s6560_s4 = inlined_call_operand.vmem [shape: f32[1,160], index: 4, kind: input, shape index: {}]   ;;  %s6561_s5 = inlined_call_operand.vmem [shape: bf16[5,160,128], index: 5, kind: input, shape index: {}]   ;;  %s6562_s6 = inlined_call_operand.vmem [shape: f32[1,128], index: 6, kind: input, shape index: {}]   ;;  %s6563_s7 = inlined_call_operand.vmem [shape: bf16[128,128], index: 7, kind: input, shape index: {}]   ;;  %s6564_s8 = inlined_call_operand.vmem [shape: f32[1,128], index: 8, kind: input, shape index: {}]   ;;  %s6565_s9 = inlined_call_operand.vmem [shape: bf16[128,128], index: 9, kind: input, shape index: {}]   ;;  %s6566_s10 = inlined_call_operand.vmem [shape: f32[1,128], index: 10, kind: input, shape index: {}]   ;;  %s6567_s11 = inlined_call_operand.hbm [shape: f32[8,128], index: 11, kind: output, shape index: {}]  }
   0x1   :  { %v4737_v0 = vld [vmem:[%s6557_s1 + $0x24] ss:$8 sps:$4 sm:$0xff]   ;;  %v4739_v1 = vld [vmem:[%s6557_s1 + $0x20] ss:$8 sps:$4 sm:$0xff]   ;;  %204 = vmatprep.mubr.bf16.mxu0 %v5067_v2  ;;  %v4740_v3 = vld [vmem:[%s6557_s1 + $0x34] ss:$8 sps:$4 sm:$0xff]  }
   0x2   :  { %172 = vmatprep.subr.bf16.mxu0 %v4737_v0  ;;  %v4742_v4 = vld [vmem:[%s6557_s1 + $0x30] ss:$8 sps:$4 sm:$0xff]   ;;  %v5147_v5 = vld [vmem:[%s6556_s0 + $0x8] sm:$0xff]  ;;  %v44_v9 = vld [vmem:[%s6556_s0 + $0x20] sm:$0xff] }
   0x3   :  { %173 = vmatpush1.bf16.msra.mxu0 %v4739_v1  ;;  %v42_v6 = vld [vmem:[%s6556_s0 + $0x10] sm:$0xff]  ;;  %v4745_v7 = vld [vmem:[%s6557_s1 + $0x4] ss:$8 sps:$4 sm:$0xff]   ;;  %v43_v8 = vld [vmem:[%s6556_s0 + $0x18] sm:$0xff] }
   0x4   :  { %174 = vmatprep.subr.bf16.mxu0 %v4740_v3  ;;  %v45_v10 = vld [vmem:[%s6556_s0 + $0x28] sm:$0xff]  ;;  %v90_v11 = vpack.c.bf16 %v42_v6, %v5147_v5  ;;  %v5165_v12 = vpack.c.bf16 %v43_v8, %v42_v6  ;;  %v46_v15 = vld [vmem:[%s6556_s0 + $0x30] sm:$0xff]  ;;  %v47_v16 = vld [vmem:[%s6556_s0 + $0x38] sm:$0xff]  ;;  %v5188_v20 = vpack.c.bf16 %v44_v9, %v43_v8 }
   0x5   :  { %v5167_v13 = vpack.c.bf16 %v45_v10, %v44_v9  ;;  %v4743_v14 = vld [vmem:[%s6557_s1] ss:$8 sps:$4 sm:$0xff]   ;;  %v4748_v17 = vld [vmem:[%s6557_s1 + $0x14] ss:$8 sps:$4 sm:$0xff]   ;;  %v4746_v18 = vld [vmem:[%s6557_s1 + $0x10] ss:$8 sps:$4 sm:$0xff]   ;;  %v5186_v19 = vpack.c.bf16 %v47_v16, %v46_v15  ;;  %v5204_v25 = vpack.c.bf16 %v46_v15, %v45_v10 }
   0x6   :  { %v48_v21 = vld [vmem:[%s6556_s0 + $0x40] sm:$0xff]  ;;  %v49_v22 = vld [vmem:[%s6556_s0 + $0x48] sm:$0xff]  ;;  %v50_v26 = vld [vmem:[%s6556_s0 + $0x50] sm:$0xff] }
   0x7   :  { %175 = vmatpush1.bf16.msra.mxu0 %v4742_v4  ;;  %v4751_v23 = vld [vmem:[%s6557_s1 + $0x44] ss:$8 sps:$4 sm:$0xff]   ;;  %v5202_v24 = vpack.c.bf16 %v49_v22, %v48_v21  ;;  %v51_v27 = vld [vmem:[%s6556_s0 + $0x58] sm:$0xff]  ;;  %v5217_v29 = vpack.c.bf16 %v48_v21, %v47_v16  ;;  %v5230_v33 = vpack.c.bf16 %v50_v26, %v49_v22  ;;  %v54_v34 = vld [vmem:[%s6556_s0 + $0x70] sm:$0xff] }
   0x8   :  { %407 = vmatprep.subr.bf16.mxu0 %v4745_v7  ;;  %v5215_v28 = vpack.c.bf16 %v51_v27, %v50_v26  ;;  %v52_v30 = vld [vmem:[%s6556_s0 + $0x60] sm:$0xff]  ;;  %v53_v31 = vld [vmem:[%s6556_s0 + $0x68] sm:$0xff]  ;;  %v55_v35 = vld [vmem:[%s6556_s0 + $0x78] sm:$0xff] }
   0x9   :  { %v5228_v32 = vpack.c.bf16 %v53_v31, %v52_v30  ;;  %v5241_v36 = vpack.c.bf16 %v55_v35, %v54_v34  ;;  %v5243_v37 = vpack.c.bf16 %v52_v30, %v51_v27  ;;  %v56_v38 = vld [vmem:[%s6556_s0 + $0x80] sm:$0xff]  ;;  %v57_v39 = vld [vmem:[%s6556_s0 + $0x88] sm:$0xff]  ;;  %v5256_v41 = vpack.c.bf16 %v54_v34, %v53_v31  ;;  %v58_v42 = vld [vmem:[%s6556_s0 + $0x90] sm:$0xff] }
   0xa   :  { %3842 = vmatmul.mubr.msk.bf16.vlgmr.msra.gmra.mrb[0].mxu0 %vm129_vm0, %v90_v11  ;;  %v5254_v40 = vpack.c.bf16 %v57_v39, %v56_v38  ;;  %v59_v43 = vld [vmem:[%s6556_s0 + $0x98] sm:$0xff]  ;;  %v5269_v45 = vpack.c.bf16 %v56_v38, %v55_v35  ;;  %v60_v46 = vld [vmem:[%s6556_s0 + $0xa0] sm:$0xff]  ;;  %v61_v47 = vld [vmem:[%s6556_s0 + $0xa8] sm:$0xff]  ;;  %v5282_v49 = vpack.c.bf16 %v58_v42, %v57_v39 }
   0xb   :  { %408 = vmatpush1.bf16.msra.mxu0 %v4743_v14  ;;  %214 = vmatprep.mubr.bf16.mxu0 %v5067_v2  ;;  %v5267_v44 = vpack.c.bf16 %v59_v43, %v58_v42  ;;  %v5280_v48 = vpack.c.bf16 %v61_v47, %v60_v46  ;;  %v62_v50 = vld [vmem:[%s6556_s0 + $0xb0] sm:$0xff]  ;;  %v63_v51 = vld [vmem:[%s6556_s0 + $0xb8] sm:$0xff]  ;;  %v5295_v53 = vpack.c.bf16 %v60_v46, %v59_v43  ;;  %v64_v55 = vld [vmem:[%s6556_s0 + $0xc0] sm:$0xff] }
   0xc   :  { %409 = vmatprep.subr.bf16.mxu0 %v4748_v17  ;;  %v5293_v52 = vpack.c.bf16 %v63_v51, %v62_v50  ;;  %v5300_v54 = vpack.c.bf16 %v62_v50, %v61_v47  ;;  %v5308_v56 = vpack.c.bf16 %v64_v55, %v63_v51  ;;  %v65_v57 = vld [vmem:[%s6556_s0 + $0xc8] sm:$0xff]  ;;  %v66_v58 = vld [vmem:[%s6556_s0 + $0xd0] sm:$0xff]  ;;  %v67_v60 = vld [vmem:[%s6556_s0 + $0xd8] sm:$0xff] }
   0xd   :  { %v5319_v59 = vpack.c.bf16 %v66_v58, %v65_v57  ;;  %v5329_v61 = vld [vmem:[%s6556_s0 + $0xe0] sm:$0xff] }
   0xe   :  { %v5333_v62 = vpack.c.bf16 %v5329_v61, %v67_v60 }
   0xf   :  { %410 = vmatpush1.bf16.msra.mxu0 %v4746_v18 }
  0x10   :  { %609 = vmatprep.subr.bf16.mxu0 %v4751_v23 }
  0x12   :  { %3843 = vmatmul.mubr.msk.bf16.gmra.mrb[4].mxu0 %vm129_vm0, %v5188_v20 }
  0x13   :  { %224 = vmatprep.mubr.bf16.mxu0 %v5067_v2 }
  0x1a   :  { %3844 = vmatmul.mubr.msk.bf16.gmra.mrb[8].mxu0 %vm129_vm0, %v5204_v25 }
  0x1b   :  { %234 = vmatprep.mubr.bf16.mxu0 %v5067_v2 }
  0x22   :  { %3845 = vmatmul.mubr.msk.bf16.gmra.mrb[12].mxu0 %vm129_vm0, %v5217_v29 }
  0x23   :  { %244 = vmatprep.mubr.bf16.mxu0 %v5067_v2 }
  0x2a   :  { %3846 = vmatmul.mubr.msk.bf16.gmra.mrb[16].mxu0 %vm129_vm0, %v5230_v33 }
  0x2b   :  { %254 = vmatprep.mubr.bf16.mxu0 %v5067_v2 }
  0x32   :  { %3847 = vmatmul.mubr.msk.bf16.gmra.mrb[20].mxu0 %vm129_vm0, %v5243_v37 }
  0x33   :  { %264 = vmatprep.mubr.bf16.mxu0 %v5067_v2 }
  0x3a   :  { %3848 = vmatmul.mubr.msk.bf16.gmra.mrb[24].mxu0 %vm129_vm0, %v5256_v41 }
  0x3b   :  { %274 = vmatprep.mubr.bf16.mxu0 %v5067_v2 }
  0x42   :  { %3849 = vmatmul.mubr.msk.bf16.gmra.mrb[28].mxu0 %vm129_vm0, %v5269_v45 }
  0x43   :  { %284 = vmatprep.mubr.bf16.mxu0 %v5067_v2 }
  0x4a   :  { %3850 = vmatmul.mubr.msk.bf16.gmra.mrb[32].mxu0 %vm129_vm0, %v5282_v49 }
  0x4b   :  { %294 = vmatprep.mubr.bf16.mxu0 %v5067_v2 }
  0x52   :  { %3851 = vmatmul.mubr.msk.bf16.gmra.mrb[36].mxu0 %vm129_vm0, %v5295_v53 }
  0x53   :  { %304 = vmatprep.mubr.bf16.mxu0 %v5067_v2 }
  0x5a   :  { %3852 = vmatmul.mubr.msk.bf16.gmra.mrb[40].mxu0 %vm129_vm0, %v5300_v54 }
  0x5b   :  { %314 = vmatprep.mubr.bf16.mxu0 %v5067_v2 }
  0x62   :  { %3853 = vmatmul.mubr.msk.bf16.gmra.mrb[44].mxu0 %vm129_vm0, %v5308_v56 }
  0x63   :  { %324 = vmatprep.mubr.bf16.mxu0 %v5067_v2 }
  0x6a   :  { %3854 = vmatmul.mubr.msk.bf16.gmra.mrb[48].mxu0 %vm129_vm0, %v5319_v59 }
  0x6b   :  { %334 = vmatprep.mubr.bf16.mxu0 %v5067_v2 }
  0x6c   :  { %16 = vsyncpa [#allocation3], 0  ;;  %v40_v63 = vld [vmem:[%s6556_s0] sm:$0xff]  ;;  %v4754_v3 = vld [vmem:[%s6557_s1 + $0x54] ss:$8 sps:$4 sm:$0xff]   ;;  %v5389_v6 = vpack.c.bf16 %v65_v57, %v64_v55  ;;  %v5394_v7 = vpack.c.bf16 %v67_v60, %v66_v58  ;;  %v1356_v50 = vlaneseq  ;;  %vm1723_vm1 = vcmask 785408  }
  0x6d   :  { %v72_v0 = vpack.c.bf16 %v5147_v5, %v40_v63  ;;  %v4749_v1 = vld [vmem:[%s6557_s1 + $0x40] ss:$8 sps:$4 sm:$0xff]   ;;  %v4752_v4 = vld [vmem:[%s6557_s1 + $0x50] ss:$8 sps:$4 sm:$0xff]   ;;  %v4757_v5 = vld [vmem:[%s6557_s1 + $0x64] ss:$8 sps:$4 sm:$0xff]  }
  0x6e   :  { %v4755_v8 = vld [vmem:[%s6557_s1 + $0x60] ss:$8 sps:$4 sm:$0xff]   ;;  %v4760_v9 = vld [vmem:[%s6557_s1 + $0x74] ss:$8 sps:$4 sm:$0xff]   ;;  %v4758_v10 = vld [vmem:[%s6557_s1 + $0x70] ss:$8 sps:$4 sm:$0xff]  }
  0x6f   :  { %v4763_v11 = vld [vmem:[%s6557_s1 + $0x84] ss:$8 sps:$4 sm:$0xff]   ;;  %v4761_v15 = vld [vmem:[%s6557_s1 + $0x80] ss:$8 sps:$4 sm:$0xff]   ;;  %v4766_v16 = vld [vmem:[%s6557_s1 + $0x94] ss:$8 sps:$4 sm:$0xff]  }
  0x70   :  { %v4764_v17 = vld [vmem:[%s6557_s1 + $0x90] ss:$8 sps:$4 sm:$0xff]   ;;  %v4767_v18 = vld [vmem:[%s6559_s3 + $0xe4] ss:$8 sps:$4 sm:$0xff]   ;;  %v4770_v21 = vld [vmem:[%s6559_s3 + $0xf4] ss:$8 sps:$4 sm:$0xff]  }
  0x71   :  { %1739 = vmatprep.subr.bf16.mxu1 %v4767_v18  ;;  %v4772_v22 = vld [vmem:[%s6559_s3 + $0xf0] ss:$8 sps:$4 sm:$0xff]   ;;  %v4773_v23 = vld [vmem:[%s6559_s3 + $0x104] ss:$8 sps:$4 sm:$0xff]   ;;  %v4776_v26 = vld [vmem:[%s6559_s3 + $0x114] ss:$8 sps:$4 sm:$0xff]  }
  0x72   :  { %3855 = vmatmul.mubr.msk.bf16.gmra.mrb[52].mxu0 %vm129_vm0, %v5333_v62  ;;  %v5531_v27 = vld [vmem:[%s6556_s0 + $0xf0] sm:$0xff]  ;;  %v4779_v31 = vld [vmem:[%s6559_s3 + $0x124] ss:$8 sps:$4 sm:$0xff]   ;;  %v4787_v38 = vld [vmem:[%s6559_s3 + $0x140] ss:$8 sps:$4 sm:$0xff]   ;;  %v5646_v51 = vshrl.u32 %v1356_v50, 7 }
  0x73   :  { %439 = vmatprep.mubr.bf16.mxu0 %v5067_v2  ;;  %v4782_v34 = vld [vmem:[%s6559_s3 + $0x134] ss:$8 sps:$4 sm:$0xff]   ;;  %v4784_v35 = vld [vmem:[%s6559_s3 + $0x130] ss:$8 sps:$4 sm:$0xff]   ;;  %v4797_v39 = vld [vmem:[%s6559_s3 + $0x184] ss:$8 sps:$4 sm:$0xff]  }
  0x74   :  { %v4800_v42 = vld [vmem:[%s6559_s3 + $0x194] ss:$8 sps:$4 sm:$0xff]   ;;  %v4802_v43 = vld [vmem:[%s6559_s3 + $0x190] ss:$8 sps:$4 sm:$0xff]   ;;  %v4805_v46 = vld [vmem:[%s6559_s3 + $0x1a0] ss:$8 sps:$4 sm:$0xff]  }
  0x75   :  { %v4806_v47 = vld [vmem:[%s6559_s3 + $0x1b4] ss:$8 sps:$4 sm:$0xff]   ;;  %vm5069_vm2 = vmmov 0   ;;  %s5070_s20 = smov [#allocation2]  }
  0x76   :  { %s3826_s21 = sshll.u32 %s5070_s20, 4  ;;  %s3827_s21 = int_to_ptr.vmem [resolvable:$true] %s3826_s21 }
  0x77   :  { %p5048_p1 = scmp.lt.s32.totalorder %s3827_s21, %s3827_s21 }
  0x7a   :  { %3860 = vmatmul.mubr.msk.bf16.vlgmr.msra.gmra.mrb[0].mxu0 %vm129_vm0, %v72_v0 }
  0x7b   :  { %610 = vmatpush1.bf16.msra.mxu0 %v4749_v1  ;;  %449 = vmatprep.mubr.bf16.mxu0 %v5067_v2 }
  0x7c   :  { %611 = vmatprep.subr.bf16.mxu0 %v4754_v3 }
  0x7f   :  { %612 = vmatpush1.bf16.msra.mxu0 %v4752_v4 }
  0x80   :  { %867 = vmatprep.subr.bf16.mxu0 %v4757_v5 }
  0x82   :  { %3861 = vmatmul.mubr.msk.bf16.gmra.mrb[4].mxu0 %vm129_vm0, %v5165_v12 }
  0x83   :  { %459 = vmatprep.mubr.bf16.mxu0 %v5067_v2 }
  0x8a   :  { %3862 = vmatmul.mubr.msk.bf16.gmra.mrb[8].mxu0 %vm129_vm0, %v5167_v13 }
  0x8b   :  { %469 = vmatprep.mubr.bf16.mxu0 %v5067_v2 }
  0x92   :  { %3863 = vmatmul.mubr.msk.bf16.gmra.mrb[12].mxu0 %vm129_vm0, %v5186_v19 }
  0x93   :  { %479 = vmatprep.mubr.bf16.mxu0 %v5067_v2 }
  0x9a   :  { %3864 = vmatmul.mubr.msk.bf16.gmra.mrb[16].mxu0 %vm129_vm0, %v5202_v24 }
  0x9b   :  { %489 = vmatprep.mubr.bf16.mxu0 %v5067_v2 }
  0xa2   :  { %3865 = vmatmul.mubr.msk.bf16.gmra.mrb[20].mxu0 %vm129_vm0, %v5215_v28 }
  0xa3   :  { %499 = vmatprep.mubr.bf16.mxu0 %v5067_v2 }
  0xaa   :  { %3866 = vmatmul.mubr.msk.bf16.gmra.mrb[24].mxu0 %vm129_vm0, %v5228_v32 }
  0xab   :  { %509 = vmatprep.mubr.bf16.mxu0 %v5067_v2 }
  0xb2   :  { %3867 = vmatmul.mubr.msk.bf16.gmra.mrb[28].mxu0 %vm129_vm0, %v5241_v36 }
  0xb3   :  { %519 = vmatprep.mubr.bf16.mxu0 %v5067_v2 }
  0xba   :  { %3868 = vmatmul.mubr.msk.bf16.gmra.mrb[32].mxu0 %vm129_vm0, %v5254_v40 }
  0xbb   :  { %529 = vmatprep.mubr.bf16.mxu0 %v5067_v2 }
  0xc2   :  { %3869 = vmatmul.mubr.msk.bf16.gmra.mrb[36].mxu0 %vm129_vm0, %v5267_v44 }
  0xc3   :  { %539 = vmatprep.mubr.bf16.mxu0 %v5067_v2 }
  0xca   :  { %3870 = vmatmul.mubr.msk.bf16.gmra.mrb[40].mxu0 %vm129_vm0, %v5280_v48 }
  0xcb   :  { %549 = vmatprep.mubr.bf16.mxu0 %v5067_v2 }
  0xd2   :  { %3871 = vmatmul.mubr.msk.bf16.gmra.mrb[44].mxu0 %vm129_vm0, %v5293_v52 }
  0xd3   :  { %559 = vmatprep.mubr.bf16.mxu0 %v5067_v2 }
  0xda   :  { %3872 = vmatmul.mubr.msk.bf16.gmra.mrb[48].mxu0 %vm129_vm0, %v5389_v6 }
  0xdb   :  { %569 = vmatprep.mubr.bf16.mxu0 %v5067_v2 }
  0xe2   :  { %3873 = vmatmul.mubr.msk.bf16.gmra.mrb[52].mxu0 %vm129_vm0, %v5394_v7 }
  0xe3   :  { %641 = vmatprep.mubr.bf16.mxu0 %v5067_v2 }
  0xea   :  { %3882 = vmatmul.mubr.msk.bf16.vlgmr.msra.gmra.mrb[0].mxu0 %vm129_vm0, %v5165_v12  ;;  %v69_v12 = vld [vmem:[%s6556_s0 + $0xe8] sm:$0xff] }
  0xeb   :  { %868 = vmatpush1.bf16.msra.mxu0 %v4755_v8  ;;  %651 = vmatprep.mubr.bf16.mxu0 %v5067_v2  ;;  %v5454_v14 = vpack.c.bf16 %v69_v12, %v5329_v61  ;;  %v838_v30 = vpack.c.bf16 %v5531_v27, %v69_v12 }
  0xec   :  { %869 = vmatprep.subr.bf16.mxu0 %v4760_v9 }
  0xef   :  { %870 = vmatpush1.bf16.msra.mxu0 %v4758_v10 }
  0xf0   :  { %1125 = vmatprep.subr.bf16.mxu0 %v4763_v11 }
  0xf2   :  { %3883 = vmatmul.mubr.msk.bf16.gmra.mrb[4].mxu0 %vm129_vm0, %v5167_v13 }
  0xf3   :  { %661 = vmatprep.mubr.bf16.mxu0 %v5067_v2 }
  0xfa   :  { %3884 = vmatmul.mubr.msk.bf16.gmra.mrb[8].mxu0 %vm129_vm0, %v5186_v19 }
  0xfb   :  { %671 = vmatprep.mubr.bf16.mxu0 %v5067_v2 }
 0x102   :  { %3885 = vmatmul.mubr.msk.bf16.gmra.mrb[12].mxu0 %vm129_vm0, %v5202_v24 }
 0x103   :  { %681 = vmatprep.mubr.bf16.mxu0 %v5067_v2 }
 0x10a   :  { %3886 = vmatmul.mubr.msk.bf16.gmra.mrb[16].mxu0 %vm129_vm0, %v5215_v28 }
 0x10b   :  { %691 = vmatprep.mubr.bf16.mxu0 %v5067_v2 }
 0x112   :  { %3887 = vmatmul.mubr.msk.bf16.gmra.mrb[20].mxu0 %vm129_vm0, %v5228_v32 }
 0x113   :  { %701 = vmatprep.mubr.bf16.mxu0 %v5067_v2 }
 0x11a   :  { %3888 = vmatmul.mubr.msk.bf16.gmra.mrb[24].mxu0 %vm129_vm0, %v5241_v36 }
 0x11b   :  { %711 = vmatprep.mubr.bf16.mxu0 %v5067_v2 }
 0x122   :  { %3889 = vmatmul.mubr.msk.bf16.gmra.mrb[28].mxu0 %vm129_vm0, %v5254_v40 }
 0x123   :  { %721 = vmatprep.mubr.bf16.mxu0 %v5067_v2 }
 0x12a   :  { %3890 = vmatmul.mubr.msk.bf16.gmra.mrb[32].mxu0 %vm129_vm0, %v5267_v44 }
 0x12b   :  { %731 = vmatprep.mubr.bf16.mxu0 %v5067_v2 }
 0x132   :  { %3891 = vmatmul.mubr.msk.bf16.gmra.mrb[36].mxu0 %vm129_vm0, %v5280_v48 }
 0x133   :  { %741 = vmatprep.mubr.bf16.mxu0 %v5067_v2 }
 0x13a   :  { %3892 = vmatmul.mubr.msk.bf16.gmra.mrb[40].mxu0 %vm129_vm0, %v5293_v52 }
 0x13b   :  { %751 = vmatprep.mubr.bf16.mxu0 %v5067_v2 }
 0x142   :  { %3893 = vmatmul.mubr.msk.bf16.gmra.mrb[44].mxu0 %vm129_vm0, %v5389_v6 }
 0x143   :  { %761 = vmatprep.mubr.bf16.mxu0 %v5067_v2 }
 0x14a   :  { %3894 = vmatmul.mubr.msk.bf16.gmra.mrb[48].mxu0 %vm129_vm0, %v5394_v7 }
 0x14b   :  { %771 = vmatprep.mubr.bf16.mxu0 %v5067_v2 }
 0x152   :  { %3895 = vmatmul.mubr.msk.bf16.gmra.mrb[52].mxu0 %vm129_vm0, %v5454_v14 }
 0x153   :  { %899 = vmatprep.mubr.bf16.mxu0 %v5067_v2 }
 0x15a   :  { %3904 = vmatmul.mubr.msk.bf16.vlgmr.msra.gmra.mrb[0].mxu0 %vm129_vm0, %v5188_v20  ;;  %v4769_v20 = vld [vmem:[%s6559_s3 + $0xe0] ss:$8 sps:$4 sm:$0xff]  }
 0x15b   :  { %1126 = vmatpush1.bf16.msra.mxu0 %v4761_v15  ;;  %909 = vmatprep.mubr.bf16.mxu0 %v5067_v2 }
 0x15c   :  { %1127 = vmatprep.subr.bf16.mxu0 %v4766_v16  ;;  %1740 = vmatpush1.bf16.msra.mxu1 %v4769_v20 }
 0x15d   :  { %1741 = vmatprep.subr.bf16.mxu1 %v4770_v21 }
 0x15f   :  { %1128 = vmatpush1.bf16.msra.mxu0 %v4764_v17 }
 0x160   :  { %1742 = vmatpush1.bf16.msra.mxu1 %v4772_v22 }
 0x161   :  { %1743 = vmatprep.subr.bf16.mxu1 %v4773_v23 }
 0x162   :  { %3905 = vmatmul.mubr.msk.bf16.gmra.mrb[4].mxu0 %vm129_vm0, %v5204_v25  ;;  %v4775_v25 = vld [vmem:[%s6559_s3 + $0x100] ss:$8 sps:$4 sm:$0xff]  }
 0x163   :  { %919 = vmatprep.mubr.bf16.mxu0 %v5067_v2 }
 0x164   :  { %1744 = vmatpush1.bf16.msra.mxu1 %v4775_v25 }
 0x165   :  { %1745 = vmatprep.subr.bf16.mxu1 %v4776_v26 }
 0x16a   :  { %3906 = vmatmul.mubr.msk.bf16.gmra.mrb[8].mxu0 %vm129_vm0, %v5217_v29  ;;  %v4778_v29 = vld [vmem:[%s6559_s3 + $0x110] ss:$8 sps:$4 sm:$0xff]  }
 0x16b   :  { %929 = vmatprep.mubr.bf16.mxu0 %v5067_v2  ;;  %1746 = vmatpush1.bf16.msra.mxu1 %v4778_v29 }
 0x16c   :  { %1747 = vmatprep.subr.bf16.mxu1 %v4779_v31 }
 0x172   :  { %3907 = vmatmul.mubr.msk.bf16.gmra.mrb[12].mxu0 %vm129_vm0, %v5230_v33  ;;  %v4781_v33 = vld [vmem:[%s6559_s3 + $0x120] ss:$8 sps:$4 sm:$0xff]  }
 0x173   :  { %939 = vmatprep.mubr.bf16.mxu0 %v5067_v2  ;;  %1748 = vmatpush1.bf16.msra.mxu1 %v4781_v33 }
 0x174   :  { %1749 = vmatprep.subr.bf16.mxu1 %v4782_v34 }
 0x177   :  { %1750 = vmatpush1.bf16.msra.mxu1 %v4784_v35 }
 0x17a   :  { %3908 = vmatmul.mubr.msk.bf16.gmra.mrb[16].mxu0 %vm129_vm0, %v5243_v37  ;;  %v4785_v37 = vld [vmem:[%s6559_s3 + $0x144] ss:$8 sps:$4 sm:$0xff]  }
 0x17b   :  { %949 = vmatprep.mubr.bf16.mxu0 %v5067_v2  ;;  %1751 = vmatprep.subr.bf16.mxu1 %v4785_v37 }
 0x17c   :  { %1752 = vmatpush1.bf16.msra.mxu1 %v4787_v38 }
 0x182   :  { %3909 = vmatmul.mubr.msk.bf16.gmra.mrb[20].mxu0 %vm129_vm0, %v5256_v41  ;;  %v71_v41 = vld [vmem:[%s6556_s0 + $0xf8] sm:$0xff] }
 0x183   :  { %959 = vmatprep.mubr.bf16.mxu0 %v5067_v2 }
 0x18a   :  { %3910 = vmatmul.mubr.msk.bf16.gmra.mrb[24].mxu0 %vm129_vm0, %v5269_v45  ;;  %v4803_v45 = vld [vmem:[%s6559_s3 + $0x1a4] ss:$8 sps:$4 sm:$0xff]  }
 0x18b   :  { %969 = vmatprep.mubr.bf16.mxu0 %v5067_v2 }
 0x192   :  { %3911 = vmatmul.mubr.msk.bf16.gmra.mrb[28].mxu0 %vm129_vm0, %v5282_v49  ;;  %v4811_v49 = vld [vmem:[%s6559_s3 + $0x4] ss:$8 sps:$4 sm:$0xff]  }
 0x193   :  { %979 = vmatprep.mubr.bf16.mxu0 %v5067_v2 }
 0x19a   :  { %3912 = vmatmul.mubr.msk.bf16.gmra.mrb[32].mxu0 %vm129_vm0, %v5295_v53  ;;  %v1354_v53 = vld [vmem:[%s6558_s2] sm:$0x3] }
 0x19b   :  { %989 = vmatprep.mubr.bf16.mxu0 %v5067_v2 }
 0x1a2   :  { %3913 = vmatmul.mubr.msk.bf16.gmra.mrb[36].mxu0 %vm129_vm0, %v5300_v54  ;;  %v1362_v54 = vsub.s32 1, %v5646_v51 }
 0x1a3   :  { %999 = vmatprep.mubr.bf16.mxu0 %v5067_v2 }
 0x1aa   :  { %3914 = vmatmul.mubr.msk.bf16.gmra.mrb[40].mxu0 %vm129_vm0, %v5308_v56  ;;  %v5659_v56 = vrot.slane %v1354_v53, %v1362_v54 }
 0x1ab   :  { %1009 = vmatprep.mubr.bf16.mxu0 %v5067_v2 }
 0x1b2   :  { %3915 = vmatmul.mubr.msk.bf16.gmra.mrb[44].mxu0 %vm129_vm0, %v5319_v59 }
 0x1b3   :  { %1019 = vmatprep.mubr.bf16.mxu0 %v5067_v2 }
 0x1ba   :  { %3916 = vmatmul.mubr.msk.bf16.gmra.mrb[48].mxu0 %vm129_vm0, %v5333_v62 }
 0x1bb   :  { %1029 = vmatprep.mubr.bf16.mxu0 %v5067_v2 }
 0x1c2   :  { %3917 = vmatmul.mubr.msk.bf16.gmra.mrb[52].mxu0 %vm129_vm0, %v838_v30 }
 0x1c3   :  { %1157 = vmatprep.mubr.bf16.mxu0 %v5067_v2 }
 0x1ca   :  { %3926 = vmatmul.mubr.msk.bf16.vlgmr.msra.gmra.mrb[0].mxu0 %vm129_vm0, %v5167_v13  ;;  %v4788_v13 = vld [vmem:[%s6559_s3 + $0x154] ss:$8 sps:$4 sm:$0xff]  }
 0x1cb   :  { %1167 = vmatprep.mubr.bf16.mxu0 %v5067_v2  ;;  %1753 = vmatprep.subr.bf16.mxu1 %v4788_v13 }
 0x1d2   :  { %3927 = vmatmul.mubr.msk.bf16.gmra.mrb[4].mxu0 %vm129_vm0, %v5186_v19  ;;  %v4790_v19 = vld [vmem:[%s6559_s3 + $0x150] ss:$8 sps:$4 sm:$0xff]  }
 0x1d3   :  { %1177 = vmatprep.mubr.bf16.mxu0 %v5067_v2  ;;  %1754 = vmatpush1.bf16.msra.mxu1 %v4790_v19 }
 0x1da   :  { %3928 = vmatmul.mubr.msk.bf16.gmra.mrb[8].mxu0 %vm129_vm0, %v5202_v24  ;;  %v4791_v24 = vld [vmem:[%s6559_s3 + $0x164] ss:$8 sps:$4 sm:$0xff]  }
 0x1db   :  { %1187 = vmatprep.mubr.bf16.mxu0 %v5067_v2  ;;  %1755 = vmatprep.subr.bf16.mxu1 %v4791_v24 }
 0x1e2   :  { %3929 = vmatmul.mubr.msk.bf16.gmra.mrb[12].mxu0 %vm129_vm0, %v5215_v28  ;;  %v4793_v28 = vld [vmem:[%s6559_s3 + $0x160] ss:$8 sps:$4 sm:$0xff]  }
 0x1e3   :  { %1197 = vmatprep.mubr.bf16.mxu0 %v5067_v2  ;;  %1756 = vmatpush1.bf16.msra.mxu1 %v4793_v28 }
 0x1ea   :  { %3930 = vmatmul.mubr.msk.bf16.gmra.mrb[16].mxu0 %vm129_vm0, %v5228_v32  ;;  %v4794_v32 = vld [vmem:[%s6559_s3 + $0x174] ss:$8 sps:$4 sm:$0xff]  }
 0x1eb   :  { %1207 = vmatprep.mubr.bf16.mxu0 %v5067_v2  ;;  %1757 = vmatprep.subr.bf16.mxu1 %v4794_v32 }
 0x1f2   :  { %3931 = vmatmul.mubr.msk.bf16.gmra.mrb[20].mxu0 %vm129_vm0, %v5241_v36  ;;  %v4796_v36 = vld [vmem:[%s6559_s3 + $0x170] ss:$8 sps:$4 sm:$0xff]  }
 0x1f3   :  { %1217 = vmatprep.mubr.bf16.mxu0 %v5067_v2  ;;  %1758 = vmatpush1.bf16.msra.mxu1 %v4796_v36 }
 0x1f4   :  { %1759 = vmatprep.subr.bf16.mxu1 %v4797_v39 }
 0x1fa   :  { %3932 = vmatmul.mubr.msk.bf16.gmra.mrb[24].mxu0 %vm129_vm0, %v5254_v40  ;;  %v4799_v40 = vld [vmem:[%s6559_s3 + $0x180] ss:$8 sps:$4 sm:$0xff]  }
 0x1fb   :  { %1227 = vmatprep.mubr.bf16.mxu0 %v5067_v2  ;;  %1760 = vmatpush1.bf16.msra.mxu1 %v4799_v40 }
 0x1fc   :  { %1761 = vmatprep.subr.bf16.mxu1 %v4800_v42 }
 0x1ff   :  { %1762 = vmatpush1.bf16.msra.mxu1 %v4802_v43 }
 0x200   :  { %1763 = vmatprep.subr.bf16.mxu1 %v4803_v45  ;;  %v4809_v45 = vld [vmem:[%s6559_s3] ss:$8 sps:$4 sm:$0xff]  }
 0x202   :  { %3933 = vmatmul.mubr.msk.bf16.gmra.mrb[28].mxu0 %vm129_vm0, %v5267_v44  ;;  %v1096_v44 = vpack.c.bf16 %v71_v41, %v5531_v27 }
 0x203   :  { %1237 = vmatprep.mubr.bf16.mxu0 %v5067_v2  ;;  %1764 = vmatpush1.bf16.msra.mxu1 %v4805_v46 }
 0x204   :  { %1765 = vmatprep.subr.bf16.mxu1 %v4806_v47 }
 0x20a   :  { %3934 = vmatmul.mubr.msk.bf16.gmra.mrb[32].mxu0 %vm129_vm0, %v5280_v48  ;;  %v4808_v48 = vld [vmem:[%s6559_s3 + $0x1b0] ss:$8 sps:$4 sm:$0xff]  }
 0x20b   :  { %1247 = vmatprep.mubr.bf16.mxu0 %v5067_v2  ;;  %1766 = vmatpush1.bf16.msra.mxu1 %v4808_v48  ;;  %v4814_v48 = vld [vmem:[%s6559_s3 + $0x14] ss:$8 sps:$4 sm:$0xff]  }
 0x20c   :  { %1977 = vmatprep.subr.bf16.mxu1 %v4811_v49 }
 0x212   :  { %3935 = vmatmul.mubr.msk.bf16.gmra.mrb[36].mxu0 %vm129_vm0, %v5293_v52  ;;  %v1358_v52 = vsub.s32 0, %v5646_v51 }
 0x213   :  { %1257 = vmatprep.mubr.bf16.mxu0 %v5067_v2 }
 0x214   :  { %v5655_v55 = vrot.slane %v1354_v53, %v1358_v52 }
 0x21a   :  { %3936 = vmatmul.mubr.msk.bf16.gmra.mrb[40].mxu0 %vm129_vm0, %v5389_v6 }
 0x21b   :  { %1267 = vmatprep.mubr.bf16.mxu0 %v5067_v2 }
 0x222   :  { %3937 = vmatmul.mubr.msk.bf16.gmra.mrb[44].mxu0 %vm129_vm0, %v5394_v7 }
 0x223   :  { %1277 = vmatprep.mubr.bf16.mxu0 %v5067_v2 }
 0x22a   :  { %3938 = vmatmul.mubr.msk.bf16.gmra.mrb[48].mxu0 %vm129_vm0, %v5454_v14 }
 0x22b   :  { %1287 = vmatprep.mubr.bf16.mxu0 %v5067_v2 }
 0x232   :  { %3939 = vmatmul.mubr.msk.bf16.gmra.mrb[52].mxu0 %vm129_vm0, %v1096_v44 }
 0x29d   :  { %v1159_v57 = vpop.f32.mrb[0].mxu0 }
 0x29e   :  { %v1366_v58 = vadd.f32 %v5655_v55, %v1159_v57  ;;  %v1161_v59 = vpop.f32.mrb[1].mxu0 }
 0x29f   :  { %v1367_v60 = vadd.f32 %v5659_v56, %v1161_v59  ;;  %v1163_v61 = vpop.f32.mrb[2].mxu0  ;;  %v4812_v59 = vld [vmem:[%s6559_s3 + $0x10] ss:$8 sps:$4 sm:$0xff]  }
 0x2a0   :  { %v1368_v62 = vadd.f32 %v5655_v55, %v1163_v61  ;;  %v1165_v63 = vpop.f32.mrb[3].mxu0  ;;  %v1422_v1 = vmax.f32 %v1366_v58, 0.0  ;;  %v4817_v61 = vld [vmem:[%s6559_s3 + $0x24] ss:$8 sps:$4 sm:$0xff]  }
 0x2a1   :  { %v1369_v0 = vadd.f32 %v5659_v56, %v1165_v63  ;;  %v1423_v4 = vmax.f32 %v1367_v60, 0.0 }
 0x2a2   :  { %v1424_v3 = vmax.f32 %v1368_v62, 0.0 }
 0x2a3   :  { %v1425_v5 = vmax.f32 %v1369_v0, 0.0 }
 0x2a4   :  { %v5665_v6 = vadd.f32 %v1424_v3, %v1422_v1 }
 0x2a5   :  { %v5667_v7 = vadd.f32 %v1425_v5, %v1423_v4  ;;  %v1169_v8 = vpop.f32.mrb[4].mxu0 }
 0x2a6   :  { %v1370_v9 = vadd.f32 %v5655_v55, %v1169_v8  ;;  %v1171_v10 = vpop.f32.mrb[5].mxu0 }
 0x2a7   :  { %v1371_v11 = vadd.f32 %v5659_v56, %v1171_v10  ;;  %v1173_v12 = vpop.f32.mrb[6].mxu0 }
 0x2a8   :  { %v1372_v14 = vadd.f32 %v5655_v55, %v1173_v12  ;;  %v1175_v15 = vpop.f32.mrb[7].mxu0  ;;  %v1426_v17 = vmax.f32 %v1370_v9, 0.0  ;;  %v4815_v9 = vld [vmem:[%s6559_s3 + $0x20] ss:$8 sps:$4 sm:$0xff]   ;;  %v4820_v12 = vld [vmem:[%s6559_s3 + $0x34] ss:$8 sps:$4 sm:$0xff]  }
 0x2a9   :  { %v1373_v16 = vadd.f32 %v5659_v56, %v1175_v15  ;;  %v1427_v20 = vmax.f32 %v1371_v11, 0.0 }
 0x2aa   :  { %v1428_v18 = vmax.f32 %v1372_v14, 0.0 }
 0x2ab   :  { %v1429_v21 = vmax.f32 %v1373_v16, 0.0 }
 0x2ac   :  { %v5673_v22 = vadd.f32 %v1428_v18, %v1426_v17 }
 0x2ad   :  { %v5675_v23 = vadd.f32 %v1429_v21, %v1427_v20  ;;  %v1179_v25 = vpop.f32.mrb[8].mxu0  ;;  %v4818_v20 = vld [vmem:[%s6559_s3 + $0x30] ss:$8 sps:$4 sm:$0xff]  }
 0x2ae   :  { %v1506_v26 = vpack.c.bf16 %v5673_v22, %v5665_v6  ;;  %v1374_v27 = vadd.f32 %v5655_v55, %v1179_v25  ;;  %v1181_v29 = vpop.f32.mrb[9].mxu0  ;;  %v4823_v25 = vld [vmem:[%s6559_s3 + $0x44] ss:$8 sps:$4 sm:$0xff]  }
 0x2af   :  { %v1507_v30 = vpack.c.bf16 %v5675_v23, %v5667_v7  ;;  %v1375_v31 = vadd.f32 %v5659_v56, %v1181_v29  ;;  %v1183_v33 = vpop.f32.mrb[10].mxu0  ;;  %v4851_v7 = vld [vmem:[%s6559_s3 + $0x1c0] ss:$8 sps:$4 sm:$0xff]  }
 0x2b0   :  { %v1376_v34 = vadd.f32 %v5655_v55, %v1183_v33  ;;  %v1185_v35 = vpop.f32.mrb[11].mxu0  ;;  %v1430_v38 = vmax.f32 %v1374_v27, 0.0 }
 0x2b1   :  { %v1377_v37 = vadd.f32 %v5659_v56, %v1185_v35  ;;  %v1431_v19 = vmax.f32 %v1375_v31, 0.0 }
 0x2b2   :  { %v1432_v13 = vmax.f32 %v1376_v34, 0.0 }
 0x2b3   :  { %v1433_v24 = vmax.f32 %v1377_v37, 0.0 }
 0x2b4   :  { %v1482_v28 = vadd.f32 %v1432_v13, %v1430_v38  ;;  %v4821_v13 = vld [vmem:[%s6559_s3 + $0x40] ss:$8 sps:$4 sm:$0xff]  }
 0x2b5   :  { %v1483_v32 = vadd.f32 %v1433_v24, %v1431_v19  ;;  %v1189_v36 = vpop.f32.mrb[12].mxu0 }
 0x2b6   :  { %v1378_v39 = vadd.f32 %v5655_v55, %v1189_v36  ;;  %v1191_v40 = vpop.f32.mrb[13].mxu0  ;;  %v1544_v41 = vpack.c.bf16 %v1482_v28, %v5673_v22 }
 0x2b7   :  { %v1379_v42 = vadd.f32 %v5659_v56, %v1191_v40  ;;  %v1193_v43 = vpop.f32.mrb[14].mxu0  ;;  %v1545_v44 = vpack.c.bf16 %v1483_v32, %v5675_v23 }
 0x2b8   :  { %v1380_v46 = vadd.f32 %v5655_v55, %v1193_v43  ;;  %v1195_v47 = vpop.f32.mrb[15].mxu0  ;;  %v1434_v50 = vmax.f32 %v1378_v39, 0.0 }
 0x2b9   :  { %v1381_v49 = vadd.f32 %v5659_v56, %v1195_v47  ;;  %3996 = vmatprep.mubr.msk.bf16.mxu1 %vm1723_vm1, %v1545_v44  ;;  %v1435_v57 = vmax.f32 %v1379_v42, 0.0  ;;  %v4824_v42 = vld [vmem:[%s6559_s3 + $0x50] ss:$8 sps:$4 sm:$0xff]   ;;  %v4829_v44 = vld [vmem:[%s6559_s3 + $0x64] ss:$8 sps:$4 sm:$0xff]  }
 0x2ba   :  { %v1436_v53 = vmax.f32 %v1380_v46, 0.0  ;;  %1772 = vmatmul.mubr.bf16.vlgmr.msra.gmra.mrb[0].mxu1 %v1544_v41 }
 0x2bb   :  { %v1437_v58 = vmax.f32 %v1381_v49, 0.0  ;;  %1978 = vmatpush1.bf16.msra.mxu1 %v4809_v45 }
 0x2bc   :  { %v1484_v60 = vadd.f32 %v1436_v53, %v1434_v50  ;;  %1979 = vmatprep.subr.bf16.mxu1 %v4814_v48 }
 0x2bd   :  { %v1485_v62 = vadd.f32 %v1437_v58, %v1435_v57  ;;  %v1199_v63 = vpop.f32.mrb[16].mxu0  ;;  %v4827_v58 = vld [vmem:[%s6559_s3 + $0x60] ss:$8 sps:$4 sm:$0xff]  }
 0x2be   :  { %v1382_v0 = vadd.f32 %v5655_v55, %v1199_v63  ;;  %v1201_v1 = vpop.f32.mrb[17].mxu0  ;;  %v5705_v3 = vpack.c.bf16 %v1484_v60, %v1482_v28  ;;  %v4826_v28 = vld [vmem:[%s6559_s3 + $0x54] ss:$8 sps:$4 sm:$0xff]  }
 0x2bf   :  { %v5707_v4 = vpack.c.bf16 %v1485_v62, %v1483_v32  ;;  %v1383_v5 = vadd.f32 %v5659_v56, %v1201_v1  ;;  %v1203_v8 = vpop.f32.mrb[18].mxu0  ;;  %1980 = vmatpush1.bf16.msra.mxu1 %v4812_v59 }
 0x2c0   :  { %v1384_v10 = vadd.f32 %v5655_v55, %v1203_v8  ;;  %v1205_v11 = vpop.f32.mrb[19].mxu0  ;;  %1981 = vmatprep.subr.bf16.mxu1 %v4817_v61  ;;  %v1438_v15 = vmax.f32 %v1382_v0, 0.0  ;;  %v4832_v61 = vld [vmem:[%s6559_s3 + $0x74] ss:$8 sps:$4 sm:$0xff]   ;;  %v4830_v8 = vld [vmem:[%s6559_s3 + $0x70] ss:$8 sps:$4 sm:$0xff]  }
 0x2c1   :  { %v1385_v14 = vadd.f32 %v5659_v56, %v1205_v11  ;;  %v1439_v17 = vmax.f32 %v1383_v5, 0.0 }
 0x2c2   :  { %v1440_v16 = vmax.f32 %v1384_v10, 0.0  ;;  %v4835_v10 = vld [vmem:[%s6559_s3 + $0x84] ss:$8 sps:$4 sm:$0xff]  }
 0x2c3   :  { %v1441_v18 = vmax.f32 %v1385_v14, 0.0  ;;  %1982 = vmatpush1.bf16.msra.mxu1 %v4815_v9 }
 0x2c4   :  { %v1486_v21 = vadd.f32 %v1440_v16, %v1438_v15  ;;  %1983 = vmatprep.subr.bf16.mxu1 %v4820_v12 }
 0x2c5   :  { %v1487_v27 = vadd.f32 %v1441_v18, %v1439_v17  ;;  %v1209_v29 = vpop.f32.mrb[20].mxu0 }
 0x2c6   :  { %v1386_v31 = vadd.f32 %v5655_v55, %v1209_v29  ;;  %v1211_v33 = vpop.f32.mrb[21].mxu0  ;;  %v5725_v34 = vpack.c.bf16 %v1486_v21, %v1484_v60  ;;  %v4838_v29 = vld [vmem:[%s6559_s3 + $0x94] ss:$8 sps:$4 sm:$0xff]  }
 0x2c7   :  { %v5727_v35 = vpack.c.bf16 %v1487_v27, %v1485_v62  ;;  %v1387_v37 = vadd.f32 %v5659_v56, %v1211_v33  ;;  %v1213_v38 = vpop.f32.mrb[22].mxu0  ;;  %1984 = vmatpush1.bf16.msra.mxu1 %v4818_v20 }
 0x2c8   :  { %v1388_v19 = vadd.f32 %v5655_v55, %v1213_v38  ;;  %v1215_v24 = vpop.f32.mrb[23].mxu0  ;;  %1985 = vmatprep.subr.bf16.mxu1 %v4823_v25  ;;  %v1442_v36 = vmax.f32 %v1386_v31, 0.0 }
 0x2c9   :  { %v1389_v32 = vadd.f32 %v5659_v56, %v1215_v24  ;;  %3997 = vmatprep.mubr.msk.bf16.mxu1 %vm1723_vm1, %v5727_v35  ;;  %v1443_v40 = vmax.f32 %v1387_v37, 0.0 }
 0x2ca   :  { %v1444_v39 = vmax.f32 %v1388_v19, 0.0  ;;  %1782 = vmatmul.mubr.bf16.gmra.mrb[4].mxu1 %v5725_v34  ;;  %v4836_v19 = vld [vmem:[%s6559_s3 + $0x90] ss:$8 sps:$4 sm:$0xff]  }
 0x2cb   :  { %v1445_v41 = vmax.f32 %v1389_v32, 0.0  ;;  %1986 = vmatpush1.bf16.msra.mxu1 %v4821_v13 }
 0x2cc   :  { %v1488_v43 = vadd.f32 %v1444_v39, %v1442_v36  ;;  %1987 = vmatprep.subr.bf16.mxu1 %v4826_v28  ;;  %v4841_v28 = vld [vmem:[%s6559_s3 + $0xa4] ss:$8 sps:$4 sm:$0xff]  }
 0x2cd   :  { %v1489_v45 = vadd.f32 %v1445_v41, %v1443_v40  ;;  %v1219_v46 = vpop.f32.mrb[24].mxu0 }
 0x2ce   :  { %v1390_v47 = vadd.f32 %v5655_v55, %v1219_v46  ;;  %v1221_v48 = vpop.f32.mrb[25].mxu0  ;;  %v5748_v49 = vpack.c.bf16 %v1488_v43, %v1486_v21  ;;  %v4833_v21 = vld [vmem:[%s6559_s3 + $0x80] ss:$8 sps:$4 sm:$0xff]  }
 0x2cf   :  { %v5750_v50 = vpack.c.bf16 %v1489_v45, %v1487_v27  ;;  %v1391_v53 = vadd.f32 %v5659_v56, %v1221_v48  ;;  %v1223_v57 = vpop.f32.mrb[26].mxu0  ;;  %1988 = vmatpush1.bf16.msra.mxu1 %v4824_v42  ;;  %v4844_v48 = vld [vmem:[%s6559_s3 + $0xb4] ss:$8 sps:$4 sm:$0xff]  }
 0x2d0   :  { %v1392_v59 = vadd.f32 %v5655_v55, %v1223_v57  ;;  %v1225_v60 = vpop.f32.mrb[27].mxu0  ;;  %1989 = vmatprep.subr.bf16.mxu1 %v4829_v44  ;;  %v1446_v63 = vmax.f32 %v1390_v47, 0.0 }
 0x2d1   :  { %v1393_v62 = vadd.f32 %v5659_v56, %v1225_v60  ;;  %v1447_v1 = vmax.f32 %v1391_v53, 0.0 }
 0x2d2   :  { %v1448_v0 = vmax.f32 %v1392_v59, 0.0 }
 0x2d3   :  { %v1449_v5 = vmax.f32 %v1393_v62, 0.0  ;;  %1990 = vmatpush1.bf16.msra.mxu1 %v4827_v58 }
 0x2d4   :  { %v1490_v9 = vadd.f32 %v1448_v0, %v1446_v63  ;;  %1991 = vmatprep.subr.bf16.mxu1 %v4832_v61  ;;  %v4842_v61 = vld [vmem:[%s6559_s3 + $0xb0] ss:$8 sps:$4 sm:$0xff]   ;;  %v4847_v63 = vld [vmem:[%s6559_s3 + $0xc4] ss:$8 sps:$4 sm:$0xff]  }
 0x2d5   :  { %v1491_v11 = vadd.f32 %v1449_v5, %v1447_v1  ;;  %v1229_v12 = vpop.f32.mrb[28].mxu0 }
 0x2d6   :  { %v1394_v14 = vadd.f32 %v5655_v55, %v1229_v12  ;;  %v1231_v15 = vpop.f32.mrb[29].mxu0  ;;  %v5768_v16 = vpack.c.bf16 %v1490_v9, %v1488_v43 }
 0x2d7   :  { %v5770_v17 = vpack.c.bf16 %v1491_v11, %v1489_v45  ;;  %v1395_v18 = vadd.f32 %v5659_v56, %v1231_v15  ;;  %v1233_v20 = vpop.f32.mrb[30].mxu0  ;;  %1992 = vmatpush1.bf16.msra.mxu1 %v4830_v8  ;;  %v4839_v45 = vld [vmem:[%s6559_s3 + $0xa0] ss:$8 sps:$4 sm:$0xff]  }
 0x2d8   :  { %v1396_v25 = vadd.f32 %v5655_v55, %v1233_v20  ;;  %v1235_v27 = vpop.f32.mrb[31].mxu0  ;;  %1993 = vmatprep.subr.bf16.mxu1 %v4835_v10  ;;  %v1450_v33 = vmax.f32 %v1394_v14, 0.0  ;;  %v4845_v14 = vld [vmem:[%s6559_s3 + $0xc0] ss:$8 sps:$4 sm:$0xff]   ;;  %v4850_v20 = vld [vmem:[%s6559_s3 + $0xd4] ss:$8 sps:$4 sm:$0xff]  }
 0x2d9   :  { %v1397_v31 = vadd.f32 %v5659_v56, %v1235_v27  ;;  %3998 = vmatprep.mubr.msk.bf16.mxu1 %vm1723_vm1, %v5770_v17  ;;  %v1451_v38 = vmax.f32 %v1395_v18, 0.0 }
 0x2da   :  { %v1452_v37 = vmax.f32 %v1396_v25, 0.0  ;;  %1792 = vmatmul.mubr.bf16.gmra.mrb[8].mxu1 %v5768_v16 }
 0x2db   :  { %v1453_v13 = vmax.f32 %v1397_v31, 0.0  ;;  %1994 = vmatpush1.bf16.msra.mxu1 %v4833_v21 }
 0x2dc   :  { %v1492_v24 = vadd.f32 %v1452_v37, %v1450_v33  ;;  %1995 = vmatprep.subr.bf16.mxu1 %v4838_v29  ;;  %v4848_v33 = vld [vmem:[%s6559_s3 + $0xd0] ss:$8 sps:$4 sm:$0xff]  }
 0x2dd   :  { %v1493_v32 = vadd.f32 %v1453_v13, %v1451_v38  ;;  %v1239_v36 = vpop.f32.mrb[32].mxu0  ;;  %v4853_v38 = vld [vmem:[%s6559_s3 + $0x1c4] ss:$8 sps:$4 sm:$0xff]  }
 0x2de   :  { %v1398_v39 = vadd.f32 %v5655_v55, %v1239_v36  ;;  %v1241_v40 = vpop.f32.mrb[33].mxu0  ;;  %v5791_v41 = vpack.c.bf16 %v1492_v24, %v1490_v9 }
 0x2df   :  { %v5793_v42 = vpack.c.bf16 %v1493_v32, %v1491_v11  ;;  %v1399_v43 = vadd.f32 %v5659_v56, %v1241_v40  ;;  %v1243_v44 = vpop.f32.mrb[34].mxu0  ;;  %1996 = vmatpush1.bf16.msra.mxu1 %v4836_v19 }
 0x2e0   :  { %v1400_v46 = vadd.f32 %v5655_v55, %v1243_v44  ;;  %v1245_v47 = vpop.f32.mrb[35].mxu0  ;;  %1997 = vmatprep.subr.bf16.mxu1 %v4841_v28  ;;  %v1454_v57 = vmax.f32 %v1398_v39, 0.0 }
 0x2e1   :  { %v1401_v53 = vadd.f32 %v5659_v56, %v1245_v47  ;;  %v1455_v59 = vmax.f32 %v1399_v43, 0.0 }
 0x2e2   :  { %v1456_v58 = vmax.f32 %v1400_v46, 0.0 }
 0x2e3   :  { %v1457_v60 = vmax.f32 %v1401_v53, 0.0  ;;  %1998 = vmatpush1.bf16.msra.mxu1 %v4839_v45 }
 0x2e4   :  { %v1494_v62 = vadd.f32 %v1456_v58, %v1454_v57  ;;  %1999 = vmatprep.subr.bf16.mxu1 %v4844_v48 }
 0x2e5   :  { %v1495_v0 = vadd.f32 %v1457_v60, %v1455_v59  ;;  %v1249_v1 = vpop.f32.mrb[36].mxu0 }
 0x2e6   :  { %v1402_v5 = vadd.f32 %v5655_v55, %v1249_v1  ;;  %v1251_v8 = vpop.f32.mrb[37].mxu0  ;;  %v5811_v9 = vpack.c.bf16 %v1494_v62, %v1492_v24 }
 0x2e7   :  { %v5813_v10 = vpack.c.bf16 %v1495_v0, %v1493_v32  ;;  %v1403_v11 = vadd.f32 %v5659_v56, %v1251_v8  ;;  %v1253_v12 = vpop.f32.mrb[38].mxu0  ;;  %2000 = vmatpush1.bf16.msra.mxu1 %v4842_v61 }
 0x2e8   :  { %v1404_v15 = vadd.f32 %v5655_v55, %v1253_v12  ;;  %v1255_v18 = vpop.f32.mrb[39].mxu0  ;;  %2001 = vmatprep.subr.bf16.mxu1 %v4847_v63  ;;  %v1458_v25 = vmax.f32 %v1402_v5, 0.0 }
 0x2e9   :  { %v1405_v21 = vadd.f32 %v5659_v56, %v1255_v18  ;;  %3999 = vmatprep.mubr.msk.bf16.mxu1 %vm1723_vm1, %v5813_v10  ;;  %v1459_v29 = vmax.f32 %v1403_v11, 0.0 }
 0x2ea   :  { %v1460_v27 = vmax.f32 %v1404_v15, 0.0  ;;  %1802 = vmatmul.mubr.bf16.gmra.mrb[12].mxu1 %v5811_v9 }
 0x2eb   :  { %v1461_v31 = vmax.f32 %v1405_v21, 0.0  ;;  %2002 = vmatpush1.bf16.msra.mxu1 %v4845_v14 }
 0x2ec   :  { %v1496_v37 = vadd.f32 %v1460_v27, %v1458_v25  ;;  %2003 = vmatprep.subr.bf16.mxu1 %v4850_v20 }
 0x2ed   :  { %v1497_v13 = vadd.f32 %v1461_v31, %v1459_v29  ;;  %v1259_v19 = vpop.f32.mrb[40].mxu0 }
 0x2ee   :  { %v1406_v24 = vadd.f32 %v5655_v55, %v1259_v19  ;;  %v1261_v28 = vpop.f32.mrb[41].mxu0  ;;  %v5834_v32 = vpack.c.bf16 %v1496_v37, %v1494_v62 }
 0x2ef   :  { %v5836_v36 = vpack.c.bf16 %v1497_v13, %v1495_v0  ;;  %v1407_v39 = vadd.f32 %v5659_v56, %v1261_v28  ;;  %v1263_v40 = vpop.f32.mrb[42].mxu0  ;;  %2004 = vmatpush1.bf16.msra.mxu1 %v4848_v33 }
 0x2f0   :  { %v1408_v43 = vadd.f32 %v5655_v55, %v1263_v40  ;;  %v1265_v44 = vpop.f32.mrb[43].mxu0  ;;  %2234 = vmatprep.subr.bf16.mxu1 %v4853_v38  ;;  %v1462_v46 = vmax.f32 %v1406_v24, 0.0 }
 0x2f1   :  { %v1409_v45 = vadd.f32 %v5659_v56, %v1265_v44  ;;  %v1463_v48 = vmax.f32 %v1407_v39, 0.0 }
 0x2f2   :  { %v1464_v47 = vmax.f32 %v1408_v43, 0.0  ;;  %v4854_v43 = vld [vmem:[%s6559_s3 + $0x1d0] ss:$8 sps:$4 sm:$0xff]  }
 0x2f3   :  { %v1465_v53 = vmax.f32 %v1409_v45, 0.0  ;;  %v4859_v45 = vld [vmem:[%s6559_s3 + $0x1e4] ss:$8 sps:$4 sm:$0xff]  }
 0x2f4   :  { %v1498_v57 = vadd.f32 %v1464_v47, %v1462_v46 }
 0x2f5   :  { %v1499_v58 = vadd.f32 %v1465_v53, %v1463_v48  ;;  %v1269_v59 = vpop.f32.mrb[44].mxu0 }
 0x2f6   :  { %v1410_v60 = vadd.f32 %v5655_v55, %v1269_v59  ;;  %v1271_v61 = vpop.f32.mrb[45].mxu0  ;;  %v5842_v62 = vpack.c.bf16 %v1498_v57, %v1496_v37 }
 0x2f7   :  { %v5844_v63 = vpack.c.bf16 %v1499_v58, %v1497_v13  ;;  %v1411_v0 = vadd.f32 %v5659_v56, %v1271_v61  ;;  %v1273_v1 = vpop.f32.mrb[46].mxu0  ;;  %v4856_v13 = vld [vmem:[%s6559_s3 + $0x1d4] ss:$8 sps:$4 sm:$0xff]  }
 0x2f8   :  { %v1412_v5 = vadd.f32 %v5655_v55, %v1273_v1  ;;  %v1275_v8 = vpop.f32.mrb[47].mxu0  ;;  %v1466_v12 = vmax.f32 %v1410_v60, 0.0  ;;  %v4862_v61 = vld [vmem:[%s6559_s3 + $0x1f4] ss:$8 sps:$4 sm:$0xff]  }
 0x2f9   :  { %v1413_v11 = vadd.f32 %v5659_v56, %v1275_v8  ;;  %4000 = vmatprep.mubr.msk.bf16.mxu1 %vm1723_vm1, %v5844_v63  ;;  %v1467_v15 = vmax.f32 %v1411_v0, 0.0 }
 0x2fa   :  { %v1468_v14 = vmax.f32 %v1412_v5, 0.0  ;;  %1812 = vmatmul.mubr.bf16.gmra.mrb[16].mxu1 %v5842_v62 }
 0x2fb   :  { %v1469_v18 = vmax.f32 %v1413_v11, 0.0  ;;  %4029 = vmatprep.mubr.msk.bf16.mxu1 %vm1723_vm1, %v1507_v30 }
 0x2fc   :  { %v5856_v20 = vadd.f32 %v1468_v14, %v1466_v12 }
 0x2fd   :  { %v5858_v21 = vadd.f32 %v1469_v18, %v1467_v15  ;;  %v1279_v25 = vpop.f32.mrb[48].mxu0 }
 0x2fe   :  { %v1414_v27 = vadd.f32 %v5655_v55, %v1279_v25  ;;  %v1281_v29 = vpop.f32.mrb[49].mxu0  ;;  %v5862_v31 = vpack.c.bf16 %v5856_v20, %v1498_v57  ;;  %v4863_v25 = vld [vmem:[%s6559_s3 + $0x200] ss:$8 sps:$4 sm:$0xff]  }
 0x2ff   :  { %v5865_v33 = vpack.c.bf16 %v5858_v21, %v1499_v58  ;;  %v1415_v37 = vadd.f32 %v5659_v56, %v1281_v29  ;;  %v1283_v38 = vpop.f32.mrb[50].mxu0  ;;  %v4857_v58 = vld [vmem:[%s6559_s3 + $0x1e0] ss:$8 sps:$4 sm:$0xff]   ;;  %v4866_v29 = vld [vmem:[%s6559_s3 + $0x210] ss:$8 sps:$4 sm:$0xff]  }
 0x300   :  { %v1416_v23 = vadd.f32 %v5655_v55, %v1283_v38  ;;  %v1285_v30 = vpop.f32.mrb[51].mxu0  ;;  %v1470_v24 = vmax.f32 %v1414_v27, 0.0  ;;  %v4868_v27 = vld [vmem:[%s6559_s3 + $0x214] ss:$8 sps:$4 sm:$0xff]   ;;  %v4869_v38 = vld [vmem:[%s6559_s3 + $0x220] ss:$8 sps:$4 sm:$0xff]  }
 0x301   :  { %v1417_v19 = vadd.f32 %v5659_v56, %v1285_v30  ;;  %v1471_v39 = vmax.f32 %v1415_v37, 0.0  ;;  %v4871_v37 = vld [vmem:[%s6559_s3 + $0x224] ss:$8 sps:$4 sm:$0xff]  }
 0x302   :  { %v1472_v28 = vmax.f32 %v1416_v23, 0.0  ;;  %2010 = vmatmul.mubr.bf16.vlgmr.msra.gmra.mrb[0].mxu1 %v1506_v26  ;;  %v4872_v23 = vld [vmem:[%s6559_s3 + $0x230] ss:$8 sps:$4 sm:$0xff]   ;;  %v4877_v30 = vld [vmem:[%s6559_s3 + $0x244] ss:$8 sps:$4 sm:$0xff]  }
 0x303   :  { %v1473_v40 = vmax.f32 %v1417_v19, 0.0  ;;  %2235 = vmatpush1.bf16.msra.mxu1 %v4851_v7  ;;  %4030 = vmatprep.mubr.msk.bf16.mxu1 %vm1723_vm1, %v5707_v4  ;;  %v4874_v7 = vld [vmem:[%s6559_s3 + $0x234] ss:$8 sps:$4 sm:$0xff]  }
 0x304   :  { %v5884_v44 = vadd.f32 %v1472_v28, %v1470_v24  ;;  %2236 = vmatprep.subr.bf16.mxu1 %v4856_v13  ;;  %v4875_v13 = vld [vmem:[%s6559_s3 + $0x240] ss:$8 sps:$4 sm:$0xff]   ;;  %v4880_v19 = vld [vmem:[%s6559_s3 + $0x254] ss:$8 sps:$4 sm:$0xff]   ;;  %v4878_v24 = vld [vmem:[%s6559_s3 + $0x250] ss:$8 sps:$4 sm:$0xff]  }
 0x305   :  { %v5889_v46 = vadd.f32 %v1473_v40, %v1471_v39  ;;  %v1289_v6 = vpop.f32.mrb[52].mxu0  ;;  %v4883_v28 = vld [vmem:[%s6559_s3 + $0x264] ss:$8 sps:$4 sm:$0xff]   ;;  %v4881_v39 = vld [vmem:[%s6559_s3 + $0x260] ss:$8 sps:$4 sm:$0xff]  }
 0x306   :  { %v1418_v22 = vadd.f32 %v5655_v55, %v1289_v6  ;;  %v1291_v26 = vpop.f32.mrb[53].mxu0  ;;  %v2337_v47 = vpack.c.bf16 %v5884_v44, %v5856_v20  ;;  %v4886_v40 = vld [vmem:[%s6559_s3 + $0x274] ss:$8 sps:$4 sm:$0xff]  }
 0x307   :  { %v2338_v48 = vpack.c.bf16 %v5889_v46, %v5858_v21  ;;  %v1419_v53 = vadd.f32 %v5659_v56, %v1291_v26  ;;  %2237 = vmatpush1.bf16.msra.mxu1 %v4854_v43  ;;  %v1293_v57 = vpop.f32.mrb[54].mxu0  ;;  %v4889_v43 = vld [vmem:[%s6559_s3 + $0x284] ss:$8 sps:$4 sm:$0xff]   ;;  %v4892_v6 = vld [vmem:[%s6559_s3 + $0x294] ss:$8 sps:$4 sm:$0xff]  }
 0x308   :  { %v1420_v59 = vadd.f32 %v5655_v55, %v1293_v57  ;;  %v1295_v60 = vpop.f32.mrb[55].mxu0  ;;  %2238 = vmatprep.subr.bf16.mxu1 %v4859_v45  ;;  %v1474_v1 = vmax.f32 %v1418_v22, 0.0  ;;  %v4860_v55 = vld [vmem:[%s6559_s3 + $0x1f0] ss:$8 sps:$4 sm:$0xff]   ;;  %v4887_v45 = vld [vmem:[%s6559_s3 + $0x280] ss:$8 sps:$4 sm:$0xff]  }
 0x309   :  { %v1421_v0 = vadd.f32 %v5659_v56, %v1295_v60  ;;  %v1475_v8 = vmax.f32 %v1419_v53, 0.0  ;;  %v4865_v56 = vld [vmem:[%s6559_s3 + $0x204] ss:$8 sps:$4 sm:$0xff]   ;;  %v4890_v22 = vld [vmem:[%s6559_s3 + $0x290] ss:$8 sps:$4 sm:$0xff]  }
 0x30a   :  { %v1476_v5 = vmax.f32 %v1420_v59, 0.0  ;;  %2020 = vmatmul.mubr.bf16.gmra.mrb[4].mxu1 %v5705_v3  ;;  %v4895_v26 = vld [vmem:[%s6559_s3 + $0x2a4] ss:$8 sps:$4 sm:$0xff]   ;;  %v4893_v53 = vld [vmem:[%s6559_s3 + $0x2a0] ss:$8 sps:$4 sm:$0xff]  }
 0x30b   :  { %v1477_v11 = vmax.f32 %v1421_v0, 0.0  ;;  %2239 = vmatpush1.bf16.msra.mxu1 %v4857_v58  ;;  %4031 = vmatprep.mubr.msk.bf16.mxu1 %vm1723_vm1, %v5750_v50  ;;  %v4898_v57 = vld [vmem:[%s6559_s3 + $0x2b4] ss:$8 sps:$4 sm:$0xff]   ;;  %v4896_v58 = vld [vmem:[%s6559_s3 + $0x2b0] ss:$8 sps:$4 sm:$0xff]  }
 0x30c   :  { %v5911_v12 = vadd.f32 %v1476_v5, %v1474_v1  ;;  %2240 = vmatprep.subr.bf16.mxu1 %v4862_v61  ;;  %v4901_v59 = vld [vmem:[%s6559_s3 + $0x2c4] ss:$8 sps:$4 sm:$0xff]   ;;  %v4899_v60 = vld [vmem:[%s6559_s3 + $0x2c0] ss:$8 sps:$4 sm:$0xff]   ;;  %v4902_v61 = vld [vmem:[%s6559_s3 + $0x2d0] ss:$8 sps:$4 sm:$0xff]  }
 0x30d   :  { %v5916_v14 = vadd.f32 %v1477_v11, %v1475_v8  ;;  %v4907_v0 = vld [vmem:[%s6559_s3 + $0x2e4] ss:$8 sps:$4 sm:$0xff]   ;;  %v4905_v1 = vld [vmem:[%s6559_s3 + $0x2e0] ss:$8 sps:$4 sm:$0xff]   ;;  %v4910_v5 = vld [vmem:[%s6559_s3 + $0x2f4] ss:$8 sps:$4 sm:$0xff]  }
 0x30e   :  { %v2614_v15 = vpack.c.bf16 %v5911_v12, %v5884_v44  ;;  %v4908_v8 = vld [vmem:[%s6559_s3 + $0x2f0] ss:$8 sps:$4 sm:$0xff]   ;;  %v4913_v11 = vld [vmem:[%s6559_s3 + $0x304] ss:$8 sps:$4 sm:$0xff]   ;;  %v4964_v21 = vld [vmem:[%s6559_s3 + $0x414] ss:$8 sps:$4 sm:$0xff]  }
 0x30f   :  { %v2615_v18 = vpack.c.bf16 %v5916_v14, %v5889_v46  ;;  %2241 = vmatpush1.bf16.msra.mxu1 %v4860_v55  ;;  %v4911_v55 = vld [vmem:[%s6559_s3 + $0x300] ss:$8 sps:$4 sm:$0xff]   ;;  %v4970_v20 = vld [vmem:[%s6559_s3 + $0x434] ss:$8 sps:$4 sm:$0xff]  }
 0x310   :  { %2242 = vmatprep.subr.bf16.mxu1 %v4865_v56  ;;  %v4916_v56 = vld [vmem:[%s6559_s3 + $0x314] ss:$8 sps:$4 sm:$0xff]   ;;  %v2891_v44 = vld [vmem:[%s6560_s4] sm:$0x3] }
 0x311   :  { %v6253_v46 = vrot.slane %v2891_v44, %v1358_v52  ;;  %v6257_v12 = vrot.slane %v2891_v44, %v1362_v54  ;;  %v4990_v44 = vld [vmem:[%s6561_s5 + $0x18] sm:$0xff]  }
 0x312   :  { %2030 = vmatmul.mubr.bf16.gmra.mrb[8].mxu1 %v5748_v49 }
 0x313   :  { %2243 = vmatpush1.bf16.msra.mxu1 %v4863_v25  ;;  %4032 = vmatprep.mubr.msk.bf16.mxu1 %vm1723_vm1, %v5793_v42  ;;  %v4914_v25 = vld [vmem:[%s6559_s3 + $0x310] ss:$8 sps:$4 sm:$0xff]  }
 0x314   :  { %2244 = vmatprep.subr.bf16.mxu1 %v4868_v27  ;;  %v4919_v27 = vld [vmem:[%s6559_s3 + $0x324] ss:$8 sps:$4 sm:$0xff]  }
 0x317   :  { %2245 = vmatpush1.bf16.msra.mxu1 %v4866_v29  ;;  %v4917_v29 = vld [vmem:[%s6559_s3 + $0x320] ss:$8 sps:$4 sm:$0xff]  }
 0x318   :  { %2246 = vmatprep.subr.bf16.mxu1 %v4871_v37  ;;  %v4922_v37 = vld [vmem:[%s6559_s3 + $0x334] ss:$8 sps:$4 sm:$0xff]  }
 0x31a   :  { %2040 = vmatmul.mubr.bf16.gmra.mrb[12].mxu1 %v5791_v41 }
 0x31b   :  { %2247 = vmatpush1.bf16.msra.mxu1 %v4869_v38  ;;  %4033 = vmatprep.mubr.msk.bf16.mxu1 %vm1723_vm1, %v5836_v36  ;;  %v4920_v38 = vld [vmem:[%s6559_s3 + $0x330] ss:$8 sps:$4 sm:$0xff]  }
 0x31c   :  { %2248 = vmatprep.subr.bf16.mxu1 %v4874_v7  ;;  %v4925_v7 = vld [vmem:[%s6559_s3 + $0x344] ss:$8 sps:$4 sm:$0xff]  }
 0x31f   :  { %2249 = vmatpush1.bf16.msra.mxu1 %v4872_v23  ;;  %v4923_v23 = vld [vmem:[%s6559_s3 + $0x340] ss:$8 sps:$4 sm:$0xff]  }
 0x320   :  { %2250 = vmatprep.subr.bf16.mxu1 %v4877_v30  ;;  %v4928_v30 = vld [vmem:[%s6559_s3 + $0x354] ss:$8 sps:$4 sm:$0xff]  }
 0x322   :  { %2050 = vmatmul.mubr.bf16.gmra.mrb[16].mxu1 %v5834_v32 }
 0x323   :  { %2251 = vmatpush1.bf16.msra.mxu1 %v4875_v13  ;;  %4090 = vmatprep.mubr.msk.bf16.mxu1 %vm1723_vm1, %v5707_v4  ;;  %v4884_v4 = vld [vmem:[%s6559_s3 + $0x270] ss:$8 sps:$4 sm:$0xff]   ;;  %v4931_v13 = vld [vmem:[%s6559_s3 + $0x364] ss:$8 sps:$4 sm:$0xff]  }
 0x324   :  { %2252 = vmatprep.subr.bf16.mxu1 %v4880_v19  ;;  %v4929_v19 = vld [vmem:[%s6559_s3 + $0x360] ss:$8 sps:$4 sm:$0xff]  }
 0x327   :  { %2253 = vmatpush1.bf16.msra.mxu1 %v4878_v24  ;;  %v4934_v24 = vld [vmem:[%s6559_s3 + $0x374] ss:$8 sps:$4 sm:$0xff]  }
 0x328   :  { %2254 = vmatprep.subr.bf16.mxu1 %v4883_v28  ;;  %v4932_v28 = vld [vmem:[%s6559_s3 + $0x370] ss:$8 sps:$4 sm:$0xff]  }
 0x32b   :  { %2255 = vmatpush1.bf16.msra.mxu1 %v4881_v39  ;;  %v4937_v39 = vld [vmem:[%s6559_s3 + $0x384] ss:$8 sps:$4 sm:$0xff]  }
 0x32c   :  { %2256 = vmatprep.subr.bf16.mxu1 %v4886_v40  ;;  %v4935_v40 = vld [vmem:[%s6559_s3 + $0x380] ss:$8 sps:$4 sm:$0xff]  }
 0x32f   :  { %2257 = vmatpush1.bf16.msra.mxu1 %v4884_v4  ;;  %v4940_v4 = vld [vmem:[%s6559_s3 + $0x394] ss:$8 sps:$4 sm:$0xff]  }
 0x330   :  { %2258 = vmatprep.subr.bf16.mxu1 %v4889_v43  ;;  %v4938_v43 = vld [vmem:[%s6559_s3 + $0x390] ss:$8 sps:$4 sm:$0xff]  }
 0x333   :  { %2259 = vmatpush1.bf16.msra.mxu1 %v4887_v45  ;;  %v4943_v45 = vld [vmem:[%s6559_s3 + $0x3a4] ss:$8 sps:$4 sm:$0xff]  }
 0x334   :  { %2260 = vmatprep.subr.bf16.mxu1 %v4892_v6  ;;  %v4941_v6 = vld [vmem:[%s6559_s3 + $0x3a0] ss:$8 sps:$4 sm:$0xff]  }
 0x337   :  { %2261 = vmatpush1.bf16.msra.mxu1 %v4890_v22  ;;  %v4949_v22 = vld [vmem:[%s6559_s3 + $0x3c4] ss:$8 sps:$4 sm:$0xff]  }
 0x338   :  { %2511 = vmatprep.subr.bf16.mxu1 %v4895_v26  ;;  %v4947_v26 = vld [vmem:[%s6559_s3 + $0x3c0] ss:$8 sps:$4 sm:$0xff]  }
 0x33a   :  { %2267 = vmatmul.mubr.bf16.vlgmr.msra.gmra.mrb[0].mxu1 %v5705_v3  ;;  %v4904_v3 = vld [vmem:[%s6559_s3 + $0x2d4] ss:$8 sps:$4 sm:$0xff]  }
 0x33b   :  { %4091 = vmatprep.mubr.msk.bf16.mxu1 %vm1723_vm1, %v5750_v50  ;;  %2512 = vmatpush1.bf16.msra.mxu1 %v4893_v53  ;;  %v4955_v53 = vld [vmem:[%s6559_s3 + $0x3e4] ss:$8 sps:$4 sm:$0xff]  }
 0x33c   :  { %2513 = vmatprep.subr.bf16.mxu1 %v4898_v57  ;;  %v4953_v57 = vld [vmem:[%s6559_s3 + $0x3e0] ss:$8 sps:$4 sm:$0xff]  }
 0x33f   :  { %2514 = vmatpush1.bf16.msra.mxu1 %v4896_v58  ;;  %v4961_v58 = vld [vmem:[%s6559_s3 + $0x404] ss:$8 sps:$4 sm:$0xff]  }
 0x340   :  { %2515 = vmatprep.subr.bf16.mxu1 %v4901_v59  ;;  %v4967_v59 = vld [vmem:[%s6559_s3 + $0x424] ss:$8 sps:$4 sm:$0xff]  }
 0x342   :  { %2277 = vmatmul.mubr.bf16.gmra.mrb[4].mxu1 %v5748_v49 }
 0x343   :  { %4092 = vmatprep.mubr.msk.bf16.mxu1 %vm1723_vm1, %v5793_v42  ;;  %2516 = vmatpush1.bf16.msra.mxu1 %v4899_v60  ;;  %v4965_v60 = vld [vmem:[%s6559_s3 + $0x420] ss:$8 sps:$4 sm:$0xff]  }
 0x344   :  { %2517 = vmatprep.subr.bf16.mxu1 %v4904_v3  ;;  %v4971_v3 = vld [vmem:[%s6559_s3 + $0x440] ss:$8 sps:$4 sm:$0xff]  }
 0x347   :  { %2518 = vmatpush1.bf16.msra.mxu1 %v4902_v61  ;;  %v4976_v61 = vld [vmem:[%s6559_s3 + $0x454] ss:$8 sps:$4 sm:$0xff]  }
 0x348   :  { %2519 = vmatprep.subr.bf16.mxu1 %v4907_v0  ;;  %v4974_v0 = vld [vmem:[%s6559_s3 + $0x450] ss:$8 sps:$4 sm:$0xff]  }
 0x34a   :  { %2287 = vmatmul.mubr.bf16.gmra.mrb[8].mxu1 %v5791_v41 }
 0x34b   :  { %4093 = vmatprep.mubr.msk.bf16.mxu1 %vm1723_vm1, %v5836_v36  ;;  %2520 = vmatpush1.bf16.msra.mxu1 %v4905_v1  ;;  %v4977_v1 = vld [vmem:[%s6561_s5 + $0x50] sm:$0xff]  }
 0x34c   :  { %2521 = vmatprep.subr.bf16.mxu1 %v4910_v5  ;;  %v4978_v5 = vld [vmem:[%s6561_s5 + $0x58] sm:$0xff]  }
 0x34f   :  { %2522 = vmatpush1.bf16.msra.mxu1 %v4908_v8  ;;  %v4979_v8 = vld [vmem:[%s6561_s5 + $0x60] sm:$0xff]  }
 0x350   :  { %2523 = vmatprep.subr.bf16.mxu1 %v4913_v11 }
 0x352   :  { %2297 = vmatmul.mubr.bf16.gmra.mrb[12].mxu1 %v5834_v32 }
 0x353   :  { %4094 = vmatprep.mubr.msk.bf16.mxu1 %vm1723_vm1, %v5865_v33  ;;  %2524 = vmatpush1.bf16.msra.mxu1 %v4911_v55 }
 0x354   :  { %2525 = vmatprep.subr.bf16.mxu1 %v4916_v56 }
 0x357   :  { %2526 = vmatpush1.bf16.msra.mxu1 %v4914_v25 }
 0x358   :  { %2527 = vmatprep.subr.bf16.mxu1 %v4919_v27 }
 0x35a   :  { %2307 = vmatmul.mubr.bf16.gmra.mrb[16].mxu1 %v5862_v31 }
 0x35b   :  { %2528 = vmatpush1.bf16.msra.mxu1 %v4917_v29  ;;  %4151 = vmatprep.mubr.msk.bf16.mxu1 %vm1723_vm1, %v5727_v35  ;;  %v4926_v35 = vld [vmem:[%s6559_s3 + $0x350] ss:$8 sps:$4 sm:$0xff]  }
 0x35c   :  { %2529 = vmatprep.subr.bf16.mxu1 %v4922_v37 }
 0x35f   :  { %2530 = vmatpush1.bf16.msra.mxu1 %v4920_v38 }
 0x360   :  { %2531 = vmatprep.subr.bf16.mxu1 %v4925_v7 }
 0x363   :  { %2532 = vmatpush1.bf16.msra.mxu1 %v4923_v23 }
 0x364   :  { %2533 = vmatprep.subr.bf16.mxu1 %v4928_v30 }
 0x367   :  { %2534 = vmatpush1.bf16.msra.mxu1 %v4926_v35 }
 0x368   :  { %2535 = vmatprep.subr.bf16.mxu1 %v4931_v13 }
 0x36b   :  { %2536 = vmatpush1.bf16.msra.mxu1 %v4929_v19 }
 0x36c   :  { %2537 = vmatprep.subr.bf16.mxu1 %v4934_v24 }
 0x36f   :  { %2538 = vmatpush1.bf16.msra.mxu1 %v4932_v28 }
 0x370   :  { %2788 = vmatprep.subr.bf16.mxu1 %v4937_v39 }
 0x372   :  { %2544 = vmatmul.mubr.bf16.vlgmr.msra.gmra.mrb[0].mxu1 %v5725_v34  ;;  %v4946_v34 = vld [vmem:[%s6559_s3 + $0x3b4] ss:$8 sps:$4 sm:$0xff]  }
 0x373   :  { %4152 = vmatprep.mubr.msk.bf16.mxu1 %vm1723_vm1, %v5770_v17  ;;  %2789 = vmatpush1.bf16.msra.mxu1 %v4935_v40  ;;  %v4944_v17 = vld [vmem:[%s6559_s3 + $0x3b0] ss:$8 sps:$4 sm:$0xff]  }
 0x374   :  { %2790 = vmatprep.subr.bf16.mxu1 %v4940_v4 }
 0x377   :  { %2791 = vmatpush1.bf16.msra.mxu1 %v4938_v43 }
 0x378   :  { %2792 = vmatprep.subr.bf16.mxu1 %v4943_v45 }
 0x37a   :  { %2554 = vmatmul.mubr.bf16.gmra.mrb[4].mxu1 %v5768_v16  ;;  %v4952_v16 = vld [vmem:[%s6559_s3 + $0x3d4] ss:$8 sps:$4 sm:$0xff]  }
 0x37b   :  { %4153 = vmatprep.mubr.msk.bf16.mxu1 %vm1723_vm1, %v5813_v10  ;;  %2793 = vmatpush1.bf16.msra.mxu1 %v4941_v6  ;;  %v4950_v10 = vld [vmem:[%s6559_s3 + $0x3d0] ss:$8 sps:$4 sm:$0xff]  }
 0x37c   :  { %2794 = vmatprep.subr.bf16.mxu1 %v4946_v34 }
 0x37f   :  { %2795 = vmatpush1.bf16.msra.mxu1 %v4944_v17 }
 0x380   :  { %2796 = vmatprep.subr.bf16.mxu1 %v4949_v22 }
 0x382   :  { %2564 = vmatmul.mubr.bf16.gmra.mrb[8].mxu1 %v5811_v9  ;;  %v4958_v9 = vld [vmem:[%s6559_s3 + $0x3f4] ss:$8 sps:$4 sm:$0xff]  }
 0x383   :  { %4154 = vmatprep.mubr.msk.bf16.mxu1 %vm1723_vm1, %v5844_v63  ;;  %2797 = vmatpush1.bf16.msra.mxu1 %v4947_v26  ;;  %v4956_v63 = vld [vmem:[%s6559_s3 + $0x3f0] ss:$8 sps:$4 sm:$0xff]  }
 0x384   :  { %2798 = vmatprep.subr.bf16.mxu1 %v4952_v16 }
 0x387   :  { %2799 = vmatpush1.bf16.msra.mxu1 %v4950_v10 }
 0x388   :  { %2800 = vmatprep.subr.bf16.mxu1 %v4955_v53  ;;  %v4987_v53 = vld [vmem:[%s6561_s5] sm:$0xff]  }
 0x38a   :  { %2574 = vmatmul.mubr.bf16.gmra.mrb[12].mxu1 %v5842_v62  ;;  %v4959_v62 = vld [vmem:[%s6559_s3 + $0x400] ss:$8 sps:$4 sm:$0xff]  }
 0x38b   :  { %4155 = vmatprep.mubr.msk.bf16.mxu1 %vm1723_vm1, %v2338_v48  ;;  %2801 = vmatpush1.bf16.msra.mxu1 %v4953_v57  ;;  %v4962_v48 = vld [vmem:[%s6559_s3 + $0x410] ss:$8 sps:$4 sm:$0xff]  }
 0x38c   :  { %2802 = vmatprep.subr.bf16.mxu1 %v4958_v9 }
 0x38f   :  { %2803 = vmatpush1.bf16.msra.mxu1 %v4956_v63 }
 0x390   :  { %2804 = vmatprep.subr.bf16.mxu1 %v4961_v58 }
 0x392   :  { %2584 = vmatmul.mubr.bf16.gmra.mrb[16].mxu1 %v2337_v47  ;;  %v4973_v47 = vld [vmem:[%s6559_s3 + $0x444] ss:$8 sps:$4 sm:$0xff]  }
 0x393   :  { %2805 = vmatpush1.bf16.msra.mxu1 %v4959_v62  ;;  %4212 = vmatprep.mubr.msk.bf16.mxu1 %vm1723_vm1, %v5750_v50  ;;  %v4968_v50 = vld [vmem:[%s6559_s3 + $0x430] ss:$8 sps:$4 sm:$0xff]  }
 0x394   :  { %2806 = vmatprep.subr.bf16.mxu1 %v4964_v21 }
 0x397   :  { %2807 = vmatpush1.bf16.msra.mxu1 %v4962_v48 }
 0x398   :  { %2808 = vmatprep.subr.bf16.mxu1 %v4967_v59 }
 0x39b   :  { %2809 = vmatpush1.bf16.msra.mxu1 %v4965_v60 }
 0x39c   :  { %2810 = vmatprep.subr.bf16.mxu1 %v4970_v20  ;;  %v4988_v20 = vld [vmem:[%s6561_s5 + $0x8] sm:$0xff]  }
 0x39f   :  { %2811 = vmatpush1.bf16.msra.mxu1 %v4968_v50 }
 0x3a0   :  { %2812 = vmatprep.subr.bf16.mxu1 %v4973_v47 }
 0x3a3   :  { %2813 = vmatpush1.bf16.msra.mxu1 %v4971_v3 }
 0x3a4   :  { %2814 = vmatprep.subr.bf16.mxu1 %v4976_v61 }
 0x3a7   :  { %2815 = vmatpush1.bf16.msra.mxu1 %v4974_v0 }
 0x3a8   :  { %3061 = vmatprep.subr.bf16.mxu1 %v5067_v2 }
 0x3aa   :  { %2821 = vmatmul.mubr.bf16.vlgmr.msra.gmra.mrb[0].mxu1 %v5748_v49  ;;  %v4980_v49 = vld [vmem:[%s6561_s5 + $0x68] sm:$0xff]  }
 0x3ab   :  { %4213 = vmatprep.mubr.msk.bf16.mxu1 %vm1723_vm1, %v5793_v42  ;;  %3062 = vmatpush1.bf16.msra.mxu1 %v4977_v1  ;;  %v4981_v42 = vld [vmem:[%s6561_s5 + $0x70] sm:$0xff]  }
 0x3ac   :  { %3063 = vmatprep.subr.bf16.mxu1 %v5067_v2 }
 0x3af   :  { %3064 = vmatpush1.bf16.msra.mxu1 %v4978_v5 }
 0x3b0   :  { %3065 = vmatprep.subr.bf16.mxu1 %v5067_v2 }
 0x3b2   :  { %2831 = vmatmul.mubr.bf16.gmra.mrb[4].mxu1 %v5791_v41  ;;  %v4982_v41 = vld [vmem:[%s6561_s5 + $0x78] sm:$0xff]  }
 0x3b3   :  { %4214 = vmatprep.mubr.msk.bf16.mxu1 %vm1723_vm1, %v5836_v36  ;;  %3066 = vmatpush1.bf16.msra.mxu1 %v4979_v8  ;;  %v4984_v36 = vld [vmem:[%s6561_s5 + $0x88] sm:$0xff]   ;;  %v4989_v8 = vld [vmem:[%s6561_s5 + $0x10] sm:$0xff]  }
 0x3b4   :  { %3067 = vmatprep.subr.bf16.mxu1 %v5067_v2 }
 0x3b7   :  { %3068 = vmatpush1.bf16.msra.mxu1 %v4980_v49 }
 0x3b8   :  { %3069 = vmatprep.subr.bf16.mxu1 %v5067_v2 }
 0x3ba   :  { %2841 = vmatmul.mubr.bf16.gmra.mrb[8].mxu1 %v5834_v32  ;;  %v4983_v32 = vld [vmem:[%s6561_s5 + $0x80] sm:$0xff]  }
 0x3bb   :  { %4215 = vmatprep.mubr.msk.bf16.mxu1 %vm1723_vm1, %v5865_v33  ;;  %3070 = vmatpush1.bf16.msra.mxu1 %v4981_v42  ;;  %v4986_v33 = vld [vmem:[%s6561_s5 + $0x98] sm:$0xff]  }
 0x3bc   :  { %3071 = vmatprep.subr.bf16.mxu1 %v5067_v2 }
 0x3bf   :  { %3072 = vmatpush1.bf16.msra.mxu1 %v4982_v41 }
 0x3c0   :  { %3073 = vmatprep.subr.bf16.mxu1 %v5067_v2 }
 0x3c2   :  { %2851 = vmatmul.mubr.bf16.gmra.mrb[12].mxu1 %v5862_v31  ;;  %v4985_v31 = vld [vmem:[%s6561_s5 + $0x90] sm:$0xff]  }
 0x3c3   :  { %4216 = vmatprep.mubr.msk.bf16.mxu1 %vm1723_vm1, %v2615_v18  ;;  %3074 = vmatpush1.bf16.msra.mxu1 %v4983_v32 }
 0x3c4   :  { %3075 = vmatprep.subr.bf16.mxu1 %v5067_v2 }
 0x3c7   :  { %3076 = vmatpush1.bf16.msra.mxu1 %v4984_v36 }
 0x3c8   :  { %3077 = vmatprep.subr.bf16.mxu1 %v5067_v2 }
 0x3ca   :  { %2861 = vmatmul.mubr.bf16.gmra.mrb[16].mxu1 %v2614_v15 }
 0x3cb   :  { %3078 = vmatpush1.bf16.msra.mxu1 %v4985_v31 }
 0x3cc   :  { %3079 = vmatprep.subr.bf16.mxu1 %v5067_v2 }
 0x3cf   :  { %3080 = vmatpush1.bf16.msra.mxu1 %v4986_v33 }
 0x3d0   :  { %3164 = vmatprep.subr.bf16.mxu1 %v5067_v2 }
 0x47d   :  { %v2822_v14 = vpop.f32.mrb[0].mxu1 }
 0x47e   :  { %v2903_v15 = vadd.f32 %v6253_v46, %v2822_v14  ;;  %v2824_v18 = vpop.f32.mrb[1].mxu1 }
 0x47f   :  { %v2904_v11 = vadd.f32 %v6257_v12, %v2824_v18  ;;  %v2826_v55 = vpop.f32.mrb[2].mxu1 }
 0x480   :  { %v2905_v56 = vadd.f32 %v6253_v46, %v2826_v55  ;;  %v2828_v25 = vpop.f32.mrb[3].mxu1  ;;  %v2923_v29 = vmax.f32 %v2903_v15, 0.0 }
 0x481   :  { %v2906_v27 = vadd.f32 %v6257_v12, %v2828_v25  ;;  %v2924_v52 = vmax.f32 %v2904_v11, 0.0 }
 0x482   :  { %v2925_v37 = vmax.f32 %v2905_v56, 0.0 }
 0x483   :  { %v2926_v38 = vmax.f32 %v2906_v27, 0.0  ;;  %v4991_v27 = vld [vmem:[%s6561_s5 + $0x20] sm:$0xff]  }
 0x484   :  { %v6263_v7 = vadd.f32 %v2925_v37, %v2923_v29 }
 0x485   :  { %v2944_v51 = vadd.f32 %v2926_v38, %v2924_v52  ;;  %v2832_v54 = vpop.f32.mrb[4].mxu1 }
 0x486   :  { %v2907_v23 = vadd.f32 %v6253_v46, %v2832_v54  ;;  %v2834_v30 = vpop.f32.mrb[5].mxu1 }
 0x487   :  { %v2908_v35 = vadd.f32 %v6257_v12, %v2834_v30  ;;  %v2836_v13 = vpop.f32.mrb[6].mxu1  ;;  %v2954_v58 = vpack.c.bf16 %v2944_v51, %v2944_v51  ;;  %v4992_v30 = vld [vmem:[%s6561_s5 + $0x28] sm:$0xff]  }
 0x488   :  { %v2909_v19 = vadd.f32 %v6253_v46, %v2836_v13  ;;  %v2838_v24 = vpop.f32.mrb[7].mxu1  ;;  %v2927_v39 = vmax.f32 %v2907_v23, 0.0 }
 0x489   :  { %v2910_v28 = vadd.f32 %v6257_v12, %v2838_v24  ;;  %v2928_v4 = vmax.f32 %v2908_v35, 0.0  ;;  %v4996_v24 = vld [vmem:[%s6561_s5 + $0x48] sm:$0xff]  }
 0x48a   :  { %v2929_v40 = vmax.f32 %v2909_v19, 0.0  ;;  %v4995_v19 = vld [vmem:[%s6561_s5 + $0x40] sm:$0xff]  }
 0x48b   :  { %v2930_v43 = vmax.f32 %v2910_v28, 0.0  ;;  %v4997_v28 = vld [vmem:[%s6561_s5 + $0xa0] sm:$0xff]  }
 0x48c   :  { %v2945_v45 = vadd.f32 %v2929_v40, %v2927_v39  ;;  %v2953_v39 = vpack.c.bf16 %v6263_v7, %v6263_v7  ;;  %v5000_v7 = vld [vmem:[%s6561_s5 + $0xb8] sm:$0xff]  }
 0x48d   :  { %v2946_v6 = vadd.f32 %v2930_v43, %v2928_v4  ;;  %v2842_v34 = vpop.f32.mrb[8].mxu1  ;;  %v4998_v4 = vld [vmem:[%s6561_s5 + $0xa8] sm:$0xff]   ;;  %v4999_v43 = vld [vmem:[%s6561_s5 + $0xb0] sm:$0xff]  }
 0x48e   :  { %v2911_v17 = vadd.f32 %v6253_v46, %v2842_v34  ;;  %v2844_v22 = vpop.f32.mrb[9].mxu1  ;;  %v2975_v57 = vpack.c.bf16 %v2945_v45, %v2945_v45  ;;  %v5001_v45 = vld [vmem:[%s6561_s5 + $0xc0] sm:$0xff]   ;;  %v5003_v34 = vld [vmem:[%s6561_s5 + $0xd0] sm:$0xff]  }
 0x48f   :  { %v2976_v26 = vpack.c.bf16 %v2946_v6, %v2946_v6  ;;  %v2912_v16 = vadd.f32 %v6257_v12, %v2844_v22  ;;  %v2846_v10 = vpop.f32.mrb[10].mxu1  ;;  %v5002_v6 = vld [vmem:[%s6561_s5 + $0xc8] sm:$0xff]   ;;  %v5005_v22 = vld [vmem:[%s6561_s5 + $0xe0] sm:$0xff]  }
 0x490   :  { %v2913_v9 = vadd.f32 %v6253_v46, %v2846_v10  ;;  %v2848_v63 = vpop.f32.mrb[11].mxu1  ;;  %v2931_v21 = vmax.f32 %v2911_v17, 0.0  ;;  %v5004_v17 = vld [vmem:[%s6561_s5 + $0xd8] sm:$0xff]  }
 0x491   :  { %v2914_v62 = vadd.f32 %v6257_v12, %v2848_v63  ;;  %4247 = vmatprep.mubr.msk.bf16.mxu1 %vm129_vm0, %v2976_v26  ;;  %v2932_v59 = vmax.f32 %v2912_v16, 0.0  ;;  %v5006_v26 = vld [vmem:[%s6561_s5 + $0xe8] sm:$0xff]   ;;  %v5007_v16 = vld [vmem:[%s6561_s5 + $0xf0] sm:$0xff]  }
 0x492   :  { %v2933_v48 = vmax.f32 %v2913_v9, 0.0  ;;  %3094 = vmatmul.mubr.bf16.vlgmr.msra.gmra.mrb[20].mxu1 %v2975_v57  ;;  %v5008_v57 = vld [vmem:[%s6561_s5 + $0xf8] sm:$0xff]   ;;  %v5009_v9 = vld [vmem:[%s6561_s5 + $0x100] sm:$0xff]   ;;  %v5010_v63 = vld [vmem:[%s6561_s5 + $0x108] sm:$0xff]  }
 0x493   :  { %v2934_v60 = vmax.f32 %v2914_v62, 0.0  ;;  %3165 = vmatpush1.bf16.msra.mxu1 %v4987_v53  ;;  %4258 = vmatprep.mubr.msk.bf16.mxu1 %vm129_vm0, %v2954_v58  ;;  %v5011_v58 = vld [vmem:[%s6561_s5 + $0x110] sm:$0xff]   ;;  %v5012_v62 = vld [vmem:[%s6561_s5 + $0x118] sm:$0xff]  }
 0x494   :  { %v6281_v50 = vadd.f32 %v2933_v48, %v2931_v21  ;;  %3166 = vmatprep.subr.bf16.mxu1 %v5067_v2  ;;  %v5013_v21 = vld [vmem:[%s6561_s5 + $0x120] sm:$0xff]   ;;  %v5014_v48 = vld [vmem:[%s6561_s5 + $0x128] sm:$0xff]  }
 0x495   :  { %v2948_v47 = vadd.f32 %v2934_v60, %v2932_v59  ;;  %v2852_v3 = vpop.f32.mrb[12].mxu1  ;;  %v5015_v59 = vld [vmem:[%s6561_s5 + $0x130] sm:$0xff]   ;;  %v5016_v60 = vld [vmem:[%s6561_s5 + $0x138] sm:$0xff]  }
 0x496   :  { %v2915_v61 = vadd.f32 %v6253_v46, %v2852_v3  ;;  %v2854_v0 = vpop.f32.mrb[13].mxu1  ;;  %v3204_v10 = vpack.c.bf16 %v6281_v50, %v6281_v50  ;;  %v5018_v3 = vld [vmem:[%s6561_s5 + $0x148] sm:$0xff]  }
 0x497   :  { %v2916_v1 = vadd.f32 %v6257_v12, %v2854_v0  ;;  %3167 = vmatpush1.bf16.msra.mxu1 %v4988_v20  ;;  %v2856_v5 = vpop.f32.mrb[14].mxu1  ;;  %v3205_v40 = vpack.c.bf16 %v2948_v47, %v2948_v47  ;;  %v5017_v20 = vld [vmem:[%s6561_s5 + $0x140] sm:$0xff]   ;;  %v5020_v0 = vld [vmem:[%s6561_s5 + $0x158] sm:$0xff]  }
 0x498   :  { %v2917_v49 = vadd.f32 %v6253_v46, %v2856_v5  ;;  %v2858_v42 = vpop.f32.mrb[15].mxu1  ;;  %3168 = vmatprep.subr.bf16.mxu1 %v5067_v2  ;;  %v2935_v32 = vmax.f32 %v2915_v61, 0.0  ;;  %v5019_v61 = vld [vmem:[%s6561_s5 + $0x150] sm:$0xff]   ;;  %v5022_v5 = vld [vmem:[%s6561_s5 + $0x168] sm:$0xff]  }
 0x499   :  { %v2918_v41 = vadd.f32 %v6257_v12, %v2858_v42  ;;  %v2936_v31 = vmax.f32 %v2916_v1, 0.0  ;;  %v5021_v1 = vld [vmem:[%s6561_s5 + $0x160] sm:$0xff]  }
 0x49a   :  { %v2937_v36 = vmax.f32 %v2917_v49, 0.0  ;;  %v5024_v49 = vld [vmem:[%s6561_s5 + $0x178] sm:$0xff]   ;;  %v5025_v42 = vld [vmem:[%s6561_s5 + $0x180] sm:$0xff]  }
 0x49b   :  { %v2938_v33 = vmax.f32 %v2918_v41, 0.0  ;;  %3169 = vmatpush1.bf16.msra.mxu1 %v4989_v8  ;;  %v5023_v8 = vld [vmem:[%s6561_s5 + $0x170] sm:$0xff]   ;;  %v5026_v41 = vld [vmem:[%s6561_s5 + $0x188] sm:$0xff]  }
 0x49c   :  { %v6295_v14 = vadd.f32 %v2937_v36, %v2935_v32  ;;  %3170 = vmatprep.subr.bf16.mxu1 %v5067_v2  ;;  %v5027_v36 = vld [vmem:[%s6563_s7] sm:$0xff]  }
 0x49d   :  { %v6298_v15 = vadd.f32 %v2938_v33, %v2936_v31  ;;  %v2862_v18 = vpop.f32.mrb[16].mxu1  ;;  %v5068_v31 = vmov 0.0   ;;  %v5028_v33 = vld [vmem:[%s6563_s7 + $0x8] sm:$0xff]  }
 0x49e   :  { %v2919_v11 = vadd.f32 %v6253_v46, %v2862_v18  ;;  %v2864_v55 = vpop.f32.mrb[17].mxu1  ;;  %v3331_v50 = vpack.c.bf16 %v6295_v14, %v6295_v14  ;;  %v5029_v14 = vld [vmem:[%s6563_s7 + $0x10] sm:$0xff]  }
 0x49f   :  { %v2920_v56 = vadd.f32 %v6257_v12, %v2864_v55  ;;  %3171 = vmatpush1.bf16.msra.mxu1 %v4990_v44  ;;  %v2866_v25 = vpop.f32.mrb[18].mxu1  ;;  %v3332_v53 = vpack.c.bf16 %v6298_v15, %v6298_v15  ;;  %v5031_v55 = vld [vmem:[%s6563_s7 + $0x20] sm:$0xff]  }
 0x4a0   :  { %v2921_v29 = vadd.f32 %v6253_v46, %v2866_v25  ;;  %v2868_v37 = vpop.f32.mrb[19].mxu1  ;;  %3172 = vmatprep.subr.bf16.mxu1 %v5067_v2  ;;  %v2939_v38 = vmax.f32 %v2919_v11, 0.0  ;;  %v4993_v46 = vld [vmem:[%s6561_s5 + $0x30] sm:$0xff]   ;;  %v5030_v11 = vld [vmem:[%s6563_s7 + $0x18] sm:$0xff]  }
 0x4a1   :  { %v2922_v52 = vadd.f32 %v6257_v12, %v2868_v37  ;;  %v2940_v54 = vmax.f32 %v2920_v56, 0.0  ;;  %v4994_v12 = vld [vmem:[%s6561_s5 + $0x38] sm:$0xff]   ;;  %v5032_v56 = vld [vmem:[%s6563_s7 + $0x28] sm:$0xff]   ;;  %v5033_v25 = vld [vmem:[%s6563_s7 + $0x30] sm:$0xff]  }
 0x4a2   :  { %v2941_v51 = vmax.f32 %v2921_v29, 0.0 }
 0x4a3   :  { %v2942_v23 = vmax.f32 %v2922_v52, 0.0  ;;  %3173 = vmatpush1.bf16.msra.mxu1 %v4991_v27  ;;  %v5034_v27 = vld [vmem:[%s6563_s7 + $0x38] sm:$0xff]  }
 0x4a4   :  { %v6311_v35 = vadd.f32 %v2941_v51, %v2939_v38  ;;  %3174 = vmatprep.subr.bf16.mxu1 %v5067_v2 }
 0x4a5   :  { %v6314_v13 = vadd.f32 %v2942_v23, %v2940_v54 }
 0x4a6   :  { %v3458_v32 = vpack.c.bf16 %v6311_v35, %v6311_v35 }
 0x4a7   :  { %3175 = vmatpush1.bf16.msra.mxu1 %v4992_v30  ;;  %v3459_v47 = vpack.c.bf16 %v6314_v13, %v6314_v13 }
 0x4a8   :  { %3176 = vmatprep.subr.bf16.mxu1 %v5067_v2 }
 0x4ab   :  { %3177 = vmatpush1.bf16.msra.mxu1 %v4993_v46 }
 0x4ac   :  { %3178 = vmatprep.subr.bf16.mxu1 %v5067_v2 }
 0x4af   :  { %3179 = vmatpush1.bf16.msra.mxu1 %v4994_v12 }
 0x4b0   :  { %3180 = vmatprep.subr.bf16.mxu1 %v5067_v2 }
 0x4b3   :  { %3181 = vmatpush1.bf16.msra.mxu1 %v4995_v19 }
 0x4b4   :  { %3182 = vmatprep.subr.bf16.mxu1 %v5067_v2 }
 0x4b7   :  { %3183 = vmatpush1.bf16.msra.mxu1 %v4996_v24 }
 0x4b8   :  { %3290 = vmatprep.subr.bf16.mxu1 %v5067_v2 }
 0x4ba   :  { %3197 = vmatmul.mubr.bf16.vlgmr.msra.gmra.mrb[24].mxu1 %v2953_v39 }
 0x4bb   :  { %3291 = vmatpush1.bf16.msra.mxu1 %v4997_v28  ;;  %4289 = vmatprep.mubr.msk.bf16.mxu1 %vm129_vm0, %v3205_v40  ;;  %v4352_v40 = vld [vmem:[%s6562_s6] ss:$0 sm:$0xff] }
 0x4bc   :  { %3292 = vmatprep.subr.bf16.mxu1 %v5067_v2 }
 0x4bf   :  { %3293 = vmatpush1.bf16.msra.mxu1 %v4998_v4 }
 0x4c0   :  { %3294 = vmatprep.subr.bf16.mxu1 %v5067_v2 }
 0x4c3   :  { %3295 = vmatpush1.bf16.msra.mxu1 %v4999_v43 }
 0x4c4   :  { %3296 = vmatprep.subr.bf16.mxu1 %v5067_v2 }
 0x4c7   :  { %3297 = vmatpush1.bf16.msra.mxu1 %v5000_v7 }
 0x4c8   :  { %3298 = vmatprep.subr.bf16.mxu1 %v5067_v2 }
 0x4cb   :  { %3299 = vmatpush1.bf16.msra.mxu1 %v5001_v45 }
 0x4cc   :  { %3300 = vmatprep.subr.bf16.mxu1 %v5067_v2 }
 0x4cf   :  { %3301 = vmatpush1.bf16.msra.mxu1 %v5002_v6 }
 0x4d0   :  { %3302 = vmatprep.subr.bf16.mxu1 %v5067_v2 }
 0x4d3   :  { %3303 = vmatpush1.bf16.msra.mxu1 %v5003_v34 }
 0x4d4   :  { %3304 = vmatprep.subr.bf16.mxu1 %v5067_v2 }
 0x4d7   :  { %3305 = vmatpush1.bf16.msra.mxu1 %v5004_v17  ;;  %v5035_v17 = vld [vmem:[%s6565_s9] sm:$0xff]  }
 0x4d8   :  { %3306 = vmatprep.subr.bf16.mxu1 %v5067_v2 }
 0x4db   :  { %3307 = vmatpush1.bf16.msra.mxu1 %v5005_v22 }
 0x4dc   :  { %3308 = vmatprep.subr.bf16.mxu1 %v5067_v2 }
 0x4df   :  { %3309 = vmatpush1.bf16.msra.mxu1 %v5006_v26  ;;  %v5036_v26 = vld [vmem:[%s6565_s9 + $0x8] sm:$0xff]  }
 0x4e0   :  { %3417 = vmatprep.subr.bf16.mxu1 %v5067_v2 }
 0x4e2   :  { %3323 = vmatmul.mubr.bf16.vlgmr.msra.gmra.mrb[28].mxu1 %v3204_v10  ;;  %v5038_v10 = vld [vmem:[%s6565_s9 + $0x18] sm:$0xff]  }
 0x4e3   :  { %3418 = vmatpush1.bf16.msra.mxu1 %v5007_v16  ;;  %4320 = vmatprep.mubr.msk.bf16.mxu1 %vm129_vm0, %v3332_v53  ;;  %v5037_v16 = vld [vmem:[%s6565_s9 + $0x10] sm:$0xff]   ;;  %v5039_v53 = vld [vmem:[%s6565_s9 + $0x20] sm:$0xff]  }
 0x4e4   :  { %3419 = vmatprep.subr.bf16.mxu1 %v5067_v2 }
 0x4e7   :  { %3420 = vmatpush1.bf16.msra.mxu1 %v5008_v57  ;;  %v5040_v57 = vld [vmem:[%s6565_s9 + $0x28] sm:$0xff]  }
 0x4e8   :  { %3421 = vmatprep.subr.bf16.mxu1 %v5067_v2 }
 0x4eb   :  { %3422 = vmatpush1.bf16.msra.mxu1 %v5009_v9  ;;  %v5041_v9 = vld [vmem:[%s6565_s9 + $0x30] sm:$0xff]  }
 0x4ec   :  { %3423 = vmatprep.subr.bf16.mxu1 %v5067_v2 }
 0x4ef   :  { %3424 = vmatpush1.bf16.msra.mxu1 %v5010_v63  ;;  %v5042_v63 = vld [vmem:[%s6565_s9 + $0x38] sm:$0xff]  }
 0x4f0   :  { %3425 = vmatprep.subr.bf16.mxu1 %v5067_v2 }
 0x4f3   :  { %3426 = vmatpush1.bf16.msra.mxu1 %v5011_v58  ;;  %v4353_v58 = vld [vmem:[%s6564_s8] ss:$0 sm:$0xff]  ;;  %s5043_s8 = scalar_lea.vmem %s3827_s21, 128 }
 0x4f4   :  { %3427 = vmatprep.subr.bf16.mxu1 %v5067_v2  ;;  %p5044_p0 = scmp.ne.s32.totalorder %s3827_s21, %s5043_s8  ;;  %p5049_p2 = scmp.lt.s32.totalorder %s5043_s8, %s5043_s8 }
 0x4f6   :  { %p5050_p3 = por %p5049_p2, %p5048_p1 }
 0x4f7   :  { %3428 = vmatpush1.bf16.msra.mxu1 %v5012_v62 }
 0x4f8   :  { %3429 = vmatprep.subr.bf16.mxu1 %v5067_v2  ;;  %p5051_p4 = pnand %p5050_p3, %p5044_p0 }
 0x4fb   :  { %3430 = vmatpush1.bf16.msra.mxu1 %v5013_v21 }
 0x4fc   :  { %3431 = vmatprep.subr.bf16.mxu1 %v5067_v2 }
 0x4ff   :  { %3432 = vmatpush1.bf16.msra.mxu1 %v5014_v48 }
 0x500   :  { %3433 = vmatprep.subr.bf16.mxu1 %v5067_v2 }
 0x503   :  { %3434 = vmatpush1.bf16.msra.mxu1 %v5015_v59 }
 0x504   :  { %3435 = vmatprep.subr.bf16.mxu1 %v5067_v2 }
 0x507   :  { %3436 = vmatpush1.bf16.msra.mxu1 %v5016_v60 }
 0x508   :  { %3544 = vmatprep.subr.bf16.mxu1 %v5067_v2 }
 0x50a   :  { %3450 = vmatmul.mubr.bf16.vlgmr.msra.gmra.mrb[32].mxu1 %v3331_v50 }
 0x50b   :  { %3545 = vmatpush1.bf16.msra.mxu1 %v5017_v20  ;;  %4351 = vmatprep.mubr.msk.bf16.mxu1 %vm129_vm0, %v3459_v47  ;;  %v4362_v47 = vld [vmem:[%s6566_s10] ss:$0 sm:$0xff] }
 0x50c   :  { %3546 = vmatprep.subr.bf16.mxu1 %v5067_v2 }
 0x50f   :  { %3547 = vmatpush1.bf16.msra.mxu1 %v5018_v3 }
 0x510   :  { %3548 = vmatprep.subr.bf16.mxu1 %v5067_v2 }
 0x513   :  { %3549 = vmatpush1.bf16.msra.mxu1 %v5019_v61 }
 0x514   :  { %3550 = vmatprep.subr.bf16.mxu1 %v5067_v2 }
 0x517   :  { %3551 = vmatpush1.bf16.msra.mxu1 %v5020_v0 }
 0x518   :  { %3552 = vmatprep.subr.bf16.mxu1 %v5067_v2 }
 0x51b   :  { %3553 = vmatpush1.bf16.msra.mxu1 %v5021_v1 }
 0x51c   :  { %3554 = vmatprep.subr.bf16.mxu1 %v5067_v2 }
 0x51f   :  { %3555 = vmatpush1.bf16.msra.mxu1 %v5022_v5 }
 0x520   :  { %3556 = vmatprep.subr.bf16.mxu1 %v5067_v2 }
 0x523   :  { %3557 = vmatpush1.bf16.msra.mxu1 %v5023_v8 }
 0x524   :  { %3558 = vmatprep.subr.bf16.mxu1 %v5067_v2 }
 0x527   :  { %3559 = vmatpush1.bf16.msra.mxu1 %v5024_v49 }
 0x528   :  { %3560 = vmatprep.subr.bf16.mxu1 %v5067_v2 }
 0x52b   :  { %3561 = vmatpush1.bf16.msra.mxu1 %v5025_v42 }
 0x52c   :  { %3562 = vmatprep.subr.bf16.mxu1 %v5067_v2 }
 0x52f   :  { %3563 = vmatpush1.bf16.msra.mxu1 %v5026_v41 }
 0x530   :  { %4389 = vmatprep.subr.bf16.mxu1 %v5068_v31 }
 0x532   :  { %3577 = vmatmul.mubr.bf16.vlgmr.msra.gmra.mrb[36].mxu1 %v3458_v32 }
 0x533   :  { %4390 = vmatpush3.bf16.msra.mxu1 %v5027_v36  ;;  %4405 = vmatprep.mubr.msk.bf16.mxu1 %vm5069_vm2, %v5068_v31 }
 0x534   :  { %4391 = vmatprep.subr.bf16.mxu1 %v5068_v31 }
 0x537   :  { %4392 = vmatpush3.bf16.msra.mxu1 %v5028_v33 }
 0x538   :  { %4393 = vmatprep.subr.bf16.mxu1 %v5068_v31 }
 0x53b   :  { %4394 = vmatpush3.bf16.msra.mxu1 %v5029_v14 }
 0x53c   :  { %4395 = vmatprep.subr.bf16.mxu1 %v5068_v31 }
 0x53f   :  { %4396 = vmatpush3.bf16.msra.mxu1 %v5030_v11 }
 0x540   :  { %4397 = vmatprep.subr.bf16.mxu1 %v5068_v31 }
 0x543   :  { %4398 = vmatpush3.bf16.msra.mxu1 %v5031_v55 }
 0x544   :  { %4399 = vmatprep.subr.bf16.mxu1 %v5068_v31 }
 0x547   :  { %4400 = vmatpush3.bf16.msra.mxu1 %v5032_v56 }
 0x548   :  { %4401 = vmatprep.subr.bf16.mxu1 %v5068_v31 }
 0x54b   :  { %4402 = vmatpush3.bf16.msra.mxu1 %v5033_v25 }
 0x54c   :  { %4403 = vmatprep.subr.bf16.mxu1 %v5068_v31 }
 0x54f   :  { %4404 = vmatpush3.bf16.msra.mxu1 %v5034_v27 }
 0x550   :  { %4409 = vmatprep.subr.bf16.mxu1 %v5068_v31 }
 0x565   :  { %v3095_v2 = vpop.f32.mrb[20].mxu1 }
 0x566   :  { %v3097_v44 = vpop.f32.mrb[21].mxu1 }
 0x567   :  { %v3098_v15 = vpop.f32.mrb[22].mxu1 }
 0x568   :  { %v3099_v18 = vpop.f32.mrb[23].mxu1 }
 0x58d   :  { %v3198_v29 = vpop.f32.mrb[24].mxu1 }
 0x58e   :  { %v3199_v37 = vadd.f32 %v3198_v29, %v3095_v2  ;;  %v3200_v52 = vpop.f32.mrb[25].mxu1 }
 0x58f   :  { %v3201_v38 = vpop.f32.mrb[26].mxu1 }
 0x590   :  { %v3202_v51 = vpop.f32.mrb[27].mxu1 }
 0x5b5   :  { %v3324_v54 = vpop.f32.mrb[28].mxu1 }
 0x5b6   :  { %v3330_v23 = vadd.f32 %v3324_v54, %v3199_v37  ;;  %v3326_v30 = vpop.f32.mrb[29].mxu1 }
 0x5b7   :  { %v3327_v35 = vpop.f32.mrb[30].mxu1 }
 0x5b8   :  { %v3328_v13 = vpop.f32.mrb[31].mxu1 }
 0x5dd   :  { %v3451_v46 = vpop.f32.mrb[32].mxu1 }
 0x5de   :  { %v3457_v12 = vadd.f32 %v3451_v46, %v3330_v23  ;;  %v3453_v19 = vpop.f32.mrb[33].mxu1 }
 0x5df   :  { %v3454_v24 = vpop.f32.mrb[34].mxu1 }
 0x5e0   :  { %v3455_v28 = vpop.f32.mrb[35].mxu1 }
 0x605   :  { %v3578_v39 = vpop.f32.mrb[36].mxu1 }
 0x606   :  { %v3584_v4 = vadd.f32 %v3578_v39, %v3457_v12  ;;  %v3580_v43 = vpop.f32.mrb[37].mxu1 }
 0x607   :  { %v3581_v7 = vpop.f32.mrb[38].mxu1 }
 0x608   :  { %v3592_v45 = vadd.f32 %v4352_v40, %v3584_v4  ;;  %v3582_v6 = vpop.f32.mrb[39].mxu1 }
 0x60a   :  { %v3593_v34 = vmax.f32 %v3592_v45, 0.0 }
 0x60c   :  { %v3594_v22 = vpack.c.bf16 %v3593_v34, %v3593_v34 }
 0x60e   :  { %4406 = vmatmul.mubr.bf16.vlgmr.msra.gmra.mrb[40].mxu1 %v3594_v22 }
 0x60f   :  { %4410 = vmatpush3.bf16.msra.mxu1 %v5035_v17  ;;  %4425 = vmatprep.mubr.msk.bf16.mxu1 %vm5069_vm2, %v5068_v31 }
 0x610   :  { %4411 = vmatprep.subr.bf16.mxu1 %v5068_v31 }
 0x613   :  { %4412 = vmatpush3.bf16.msra.mxu1 %v5036_v26 }
 0x614   :  { %4413 = vmatprep.subr.bf16.mxu1 %v5068_v31 }
 0x617   :  { %4414 = vmatpush3.bf16.msra.mxu1 %v5037_v16 }
 0x618   :  { %4415 = vmatprep.subr.bf16.mxu1 %v5068_v31 }
 0x61b   :  { %4416 = vmatpush3.bf16.msra.mxu1 %v5038_v10 }
 0x61c   :  { %4417 = vmatprep.subr.bf16.mxu1 %v5068_v31 }
 0x61f   :  { %4418 = vmatpush3.bf16.msra.mxu1 %v5039_v53 }
 0x620   :  { %4419 = vmatprep.subr.bf16.mxu1 %v5068_v31 }
 0x623   :  { %4420 = vmatpush3.bf16.msra.mxu1 %v5040_v57 }
 0x624   :  { %4421 = vmatprep.subr.bf16.mxu1 %v5068_v31 }
 0x627   :  { %4422 = vmatpush3.bf16.msra.mxu1 %v5041_v9 }
 0x628   :  { %4423 = vmatprep.subr.bf16.mxu1 %v5068_v31 }
 0x62b   :  { %4424 = vmatpush3.bf16.msra.mxu1 %v5042_v63 }
 0x6e1   :  { %v3700_v62 = vpop.f32.mrb[40].mxu1 }
 0x6e2   :  { %v3701_v21 = vadd.f32 %v4353_v58, %v3700_v62  ;;  %v4407_v48 = vpop.f32.mrb[41].mxu1 }
 0x6e3   :  { %v3703_v59 = vpop.f32.mrb[42].mxu1 }
 0x6e4   :  { %v3706_v60 = vmax.f32 %v3701_v21, 0.0  ;;  %v4408_v20 = vpop.f32.mrb[43].mxu1 }
 0x6e6   :  { %v3707_v50 = vpack.c.bf16 %v3706_v60, %v3706_v60 }
 0x6e8   :  { %4426 = vmatmul.mubr.bf16.vlgmr.msra.gmra.mrb[44].mxu1 %v3707_v50 }
 0x7bb   :  { %v3813_v3 = vpop.f32.mrb[44].mxu1 }
 0x7bc   :  { %v3814_v61 = vadd.f32 %v4362_v47, %v3813_v3  ;;  %v4427_v0 = vpop.f32.mrb[45].mxu1 }
 0x7bd   :  { %v3816_v1 = vpop.f32.mrb[46].mxu1 }
 0x7be   :  { %3819 = vst [vmem:[#allocation2] sm:$0xff] %v3814_v61  ;;  %v4428_v5 = vpop.f32.mrb[47].mxu1 }
 0x7bf   :  { %5054 = shalt.err (!%p5051_p4)
}
 0x7c0   :  { %s5055_s10 = scalar_lea.hbm %s6567_s11, 128 }
 0x7c1   :  { %p5056_p5 = scmp.ne.s32.totalorder %s6567_s11, %s5055_s10  ;;  %p5059_p6 = scmp.lt.u32.totalorder %s5055_s10, %s6567_s11 }
 0x7c3   :  { %p5061_p7 = pnand %p5059_p6, %p5056_p5 }
 0x7c5   :  { %5064 = shalt.err (!%p5061_p7)
}
 0x7c6   :  { %3829 = dma.vmem_to_hbm [thread:$0]  %s3827_s21, 128, %s6567_s11, [#allocation3]  }
 0x7c7   :  { %5065 = dma.done.wait [#allocation3], 128  }
 0x7c8   :  { %5066 = vsyncadd [#allocation3], 4294967168 }
 0x7c9   :  { %3833 = vsyncpa [#allocation3], 1 }

</bundles_post_ra>
